<compile_context>
chip_gen: v6e
topology: v6e:2x2x1
jax: 0.10.0
libtpu: 0.0.40
codegen_flags: <defaults>
</compile_context>

<pallas_src>
import jax
import jax.numpy as jnp
from jax.experimental import pallas as pl
from jax.experimental.pallas import tpu as pltpu


def _mlp_kernel(x_ref, w1_ref, b1_ref, w2_ref, b2_ref, noise_ref,
                w3_ref, b3_ref, w4_ref, b4_ref, o_ref):
    # Encoder: Linear -> ReLU -> Linear -> ReLU  (bf16 MXU inputs, f32 accumulate)
    xb = x_ref[...].astype(jnp.bfloat16)
    h = jnp.dot(xb, w1_ref[...], preferred_element_type=jnp.float32)
    h = jnp.maximum(h + b1_ref[...], 0.0).astype(jnp.bfloat16)  # cast fused into ReLU pass
    h = jnp.dot(h, w2_ref[...], preferred_element_type=jnp.float32)
    h = jnp.maximum(h + b2_ref[...], 0.0)
    # Add fixed noise vector (broadcast over batch), keep f32 for the add.
    h = (h + noise_ref[...]).astype(jnp.bfloat16)
    # Decoder: Linear -> ReLU -> Linear -> ReLU
    h = jnp.dot(h, w3_ref[...], preferred_element_type=jnp.float32)
    h = jnp.maximum(h + b3_ref[...], 0.0).astype(jnp.bfloat16)
    h = jnp.dot(h, w4_ref[...], preferred_element_type=jnp.float32)
    o_ref[...] = jnp.maximum(h + b4_ref[...], 0.0)


def noise_edge_autoencoder_forward(x, params):
    """x: (B, C, H, W) float32. Returns (B, C, H, W) float32."""
    B, C, H, W = x.shape
    D = C * H * W
    x_flat = x.reshape(B, D)  # same as torch .view(B, -1) (row-major NCHW)

    w1, b1, w2, b2, noise, w3, b3, w4, b4 = params
    H1 = w1.shape[1]
    H2 = w2.shape[1]

    # Batch tile: multiple of 8 sublanes, capped at 128; pad batch up to a multiple.
    TB = min(128, ((B + 7) // 8) * 8)
    padded_B = ((B + TB - 1) // TB) * TB
    if padded_B != B:
        x_flat = jnp.pad(x_flat, ((0, padded_B - B), (0, 0)))
    num_tiles = padded_B // TB

    # Resident (non-streamed) operands: constant index_map -> DMA'd once into VMEM.
    resident = lambda a: pl.BlockSpec(a.shape, lambda i: tuple(0 for _ in a.shape))

    # Only shard the batch axis across cores when there is enough work per core
    # to amortize duplicating the resident weight DMA (v7x megacore note).
    semantics = ("parallel",) if num_tiles >= 8 else ("arbitrary",)

    flops = 2 * B * (D * H1 + H1 * H2 + H2 * H1 + H1 * D)
    bytes_accessed = (
        B * D * 4            # x (f32)
        + B * D * 4          # out (f32)
        + sum(int(a.size) * a.dtype.itemsize
              for a in (w1, b1, w2, b2, noise, w3, b3, w4, b4))
    )

    out_flat = pl.pallas_call(
        _mlp_kernel,
        out_shape=jax.ShapeDtypeStruct((padded_B, D), jnp.float32),
        grid=(num_tiles,),
        in_specs=[
            pl.BlockSpec((TB, D), lambda i: (i, 0)),   # x tile streams
            resident(w1), resident(b1),
            resident(w2), resident(b2),
            resident(noise),
            resident(w3), resident(b3),
            resident(w4), resident(b4),
        ],
        out_specs=pl.BlockSpec((TB, D), lambda i: (i, 0)),
        compiler_params=pltpu.CompilerParams(dimension_semantics=semantics),
        cost_estimate=pl.CostEstimate(flops=flops, transcendentals=0,
                                      bytes_accessed=bytes_accessed),
    )(x_flat, w1, b1, w2, b2, noise, w3, b3, w4, b4)

    return out_flat[:B].reshape(B, C, H, W)


def init_params(key, input_dim, hidden_dim1, hidden_dim2):
    """Deterministic init matching nn.Linear default (U[-1/sqrt(fan_in), 1/sqrt(fan_in)]).
    Weights stored as (in_features, out_features) in bfloat16; biases/noise in f32."""
    ks = jax.random.split(key, 9)

    def linear(kw, kb, fan_in, fan_out):
        bound = 1.0 / jnp.sqrt(jnp.float32(fan_in))
        w = jax.random.uniform(kw, (fan_in, fan_out), jnp.float32, -bound, bound)
        b = jax.random.uniform(kb, (1, fan_out), jnp.float32, -bound, bound)
        return w.astype(jnp.bfloat16), b

    w1, b1 = linear(ks[0], ks[1], input_dim, hidden_dim1)      # encoder L1
    w2, b2 = linear(ks[2], ks[3], hidden_dim1, hidden_dim2)    # encoder L2
    noise = jax.random.normal(ks[4], (1, hidden_dim2), jnp.float32)  # np.random.normal(0,1,h2)
    w3, b3 = linear(ks[5], ks[6], hidden_dim2, hidden_dim1)    # decoder L1
    w4, b4 = linear(ks[7], ks[8], hidden_dim1, input_dim)      # decoder L2
    return (w1, b1, w2, b2, noise, w3, b3, w4, b4)


if __name__ == "__main__":
    B, C, H, W = 2, 4, 16, 16
    input_dim = C * H * W          # 1024
    hidden_dim1 = 256
    hidden_dim2 = 128

    key = jax.random.PRNGKey(0)
    k_x, k_p = jax.random.split(key)
    x = jax.random.normal(k_x, (B, C, H, W), jnp.float32)
    params = init_params(k_p, input_dim, hidden_dim1, hidden_dim2)

    out = noise_edge_autoencoder_forward(x, params)
    jax.block_until_ready(out)

    # Sanity check against a pure-JAX reference using the same bf16-weight math.
    w1, b1, w2, b2, noise, w3, b3, w4, b4 = params
    xf = x.reshape(B, -1)
    r = jnp.dot(xf.astype(jnp.bfloat16), w1, preferred_element_type=jnp.float32)
    r = jnp.maximum(r + b1, 0.0).astype(jnp.bfloat16)
    r = jnp.dot(r, w2, preferred_element_type=jnp.float32)
    r = jnp.maximum(r + b2, 0.0)
    r = (r + noise).astype(jnp.bfloat16)
    r = jnp.dot(r, w3, preferred_element_type=jnp.float32)
    r = jnp.maximum(r + b3, 0.0).astype(jnp.bfloat16)
    r = jnp.dot(r, w4, preferred_element_type=jnp.float32)
    r = jnp.maximum(r + b4, 0.0)
    ref = r.reshape(B, C, H, W)

    assert out.shape == x.shape and out.dtype == jnp.float32
    assert jnp.allclose(out, ref, atol=2e-3, rtol=2e-3)

    print("KERNEL_OK")
</pallas_src>

<mosaic_0001>
module attributes {stable_mosaic.version = 11 : i64} {
  func.func @_mlp_kernel(%arg0: i32, %arg1: memref<8x1024xf32, #tpu.memory_space<vmem>>, %arg2: memref<1024x256xbf16, #tpu.memory_space<vmem>>, %arg3: memref<1x256xf32, #tpu.memory_space<vmem>>, %arg4: memref<256x128xbf16, #tpu.memory_space<vmem>>, %arg5: memref<1x128xf32, #tpu.memory_space<vmem>>, %arg6: memref<1x128xf32, #tpu.memory_space<vmem>>, %arg7: memref<128x256xbf16, #tpu.memory_space<vmem>>, %arg8: memref<1x256xf32, #tpu.memory_space<vmem>>, %arg9: memref<256x1024xbf16, #tpu.memory_space<vmem>>, %arg10: memref<1x1024xf32, #tpu.memory_space<vmem>>, %arg11: memref<8x1024xf32, #tpu.memory_space<vmem>>) attributes {dimension_semantics = [#tpu.dimension_semantics<arbitrary>], iteration_bounds = array<i64: 1>, scalar_prefetch = 0 : i64, scratch_operands = 0 : i64, tpu.core_type = #tpu.core_type<tc>, window_params = [{transform_indices = @transform_0, window_bounds = array<i64: 8, 1024>}, {pipeline_mode = #tpu.pipeline_mode<synchronous>, transform_indices = @transform_1, window_bounds = array<i64: 1024, 256>}, {pipeline_mode = #tpu.pipeline_mode<synchronous>, transform_indices = @transform_2, window_bounds = array<i64: 1, 256>}, {pipeline_mode = #tpu.pipeline_mode<synchronous>, transform_indices = @transform_3, window_bounds = array<i64: 256, 128>}, {pipeline_mode = #tpu.pipeline_mode<synchronous>, transform_indices = @transform_4, window_bounds = array<i64: 1, 128>}, {pipeline_mode = #tpu.pipeline_mode<synchronous>, transform_indices = @transform_5, window_bounds = array<i64: 1, 128>}, {pipeline_mode = #tpu.pipeline_mode<synchronous>, transform_indices = @transform_6, window_bounds = array<i64: 128, 256>}, {pipeline_mode = #tpu.pipeline_mode<synchronous>, transform_indices = @transform_7, window_bounds = array<i64: 1, 256>}, {pipeline_mode = #tpu.pipeline_mode<synchronous>, transform_indices = @transform_8, window_bounds = array<i64: 256, 1024>}, {pipeline_mode = #tpu.pipeline_mode<synchronous>, transform_indices = @transform_9, window_bounds = array<i64: 1, 1024>}, {transform_indices = @transform_10, window_bounds = array<i64: 8, 1024>}]} {
    %c0 = arith.constant 0 : index
    %c0_0 = arith.constant 0 : index
    %0 = vector.load %arg1[%c0, %c0_0] : memref<8x1024xf32, #tpu.memory_space<vmem>>, vector<8x1024xf32>
    %1 = arith.truncf %0 : vector<8x1024xf32> to vector<8x1024xbf16>
    %c0_1 = arith.constant 0 : index
    %c0_2 = arith.constant 0 : index
    %2 = vector.load %arg2[%c0_1, %c0_2] : memref<1024x256xbf16, #tpu.memory_space<vmem>>, vector<1024x256xbf16>
    %cst = arith.constant dense<0.000000e+00> : vector<8x256xf32>
    %3 = tpu.matmul %1, %2, %cst {dimension_numbers = #tpu.dot_dimension_numbers<[1], [0], [0], [1], [0, 0, 1, 1], [], []>} : vector<8x1024xbf16>, vector<1024x256xbf16>, vector<8x256xf32> -> vector<8x256xf32>
    %c0_3 = arith.constant 0 : index
    %c0_4 = arith.constant 0 : index
    %4 = vector.load %arg3[%c0_3, %c0_4] : memref<1x256xf32, #tpu.memory_space<vmem>>, vector<1x256xf32>
    %5 = vector.broadcast %4 : vector<1x256xf32> to vector<8x256xf32>
    %6 = arith.addf %3, %5 : vector<8x256xf32>
    %cst_5 = arith.constant 0.000000e+00 : f32
    %7 = vector.broadcast %cst_5 : f32 to vector<8x256xf32>
    %8 = arith.maximumf %6, %7 : vector<8x256xf32>
    %9 = arith.truncf %8 : vector<8x256xf32> to vector<8x256xbf16>
    %c0_6 = arith.constant 0 : index
    %c0_7 = arith.constant 0 : index
    %10 = vector.load %arg4[%c0_6, %c0_7] : memref<256x128xbf16, #tpu.memory_space<vmem>>, vector<256x128xbf16>
    %cst_8 = arith.constant dense<0.000000e+00> : vector<8x128xf32>
    %11 = tpu.matmul %9, %10, %cst_8 {dimension_numbers = #tpu.dot_dimension_numbers<[1], [0], [0], [1], [0, 0, 1, 1], [], []>} : vector<8x256xbf16>, vector<256x128xbf16>, vector<8x128xf32> -> vector<8x128xf32>
    %c0_9 = arith.constant 0 : index
    %c0_10 = arith.constant 0 : index
    %12 = vector.load %arg5[%c0_9, %c0_10] : memref<1x128xf32, #tpu.memory_space<vmem>>, vector<1x128xf32>
    %13 = vector.broadcast %12 : vector<1x128xf32> to vector<8x128xf32>
    %14 = arith.addf %11, %13 : vector<8x128xf32>
    %cst_11 = arith.constant 0.000000e+00 : f32
    %15 = vector.broadcast %cst_11 : f32 to vector<8x128xf32>
    %16 = arith.maximumf %14, %15 : vector<8x128xf32>
    %c0_12 = arith.constant 0 : index
    %c0_13 = arith.constant 0 : index
    %17 = vector.load %arg6[%c0_12, %c0_13] : memref<1x128xf32, #tpu.memory_space<vmem>>, vector<1x128xf32>
    %18 = vector.broadcast %17 : vector<1x128xf32> to vector<8x128xf32>
    %19 = arith.addf %16, %18 : vector<8x128xf32>
    %20 = arith.truncf %19 : vector<8x128xf32> to vector<8x128xbf16>
    %c0_14 = arith.constant 0 : index
    %c0_15 = arith.constant 0 : index
    %21 = vector.load %arg7[%c0_14, %c0_15] : memref<128x256xbf16, #tpu.memory_space<vmem>>, vector<128x256xbf16>
    %cst_16 = arith.constant dense<0.000000e+00> : vector<8x256xf32>
    %22 = tpu.matmul %20, %21, %cst_16 {dimension_numbers = #tpu.dot_dimension_numbers<[1], [0], [0], [1], [0, 0, 1, 1], [], []>} : vector<8x128xbf16>, vector<128x256xbf16>, vector<8x256xf32> -> vector<8x256xf32>
    %c0_17 = arith.constant 0 : index
    %c0_18 = arith.constant 0 : index
    %23 = vector.load %arg8[%c0_17, %c0_18] : memref<1x256xf32, #tpu.memory_space<vmem>>, vector<1x256xf32>
    %24 = vector.broadcast %23 : vector<1x256xf32> to vector<8x256xf32>
    %25 = arith.addf %22, %24 : vector<8x256xf32>
    %cst_19 = arith.constant 0.000000e+00 : f32
    %26 = vector.broadcast %cst_19 : f32 to vector<8x256xf32>
    %27 = arith.maximumf %25, %26 : vector<8x256xf32>
    %28 = arith.truncf %27 : vector<8x256xf32> to vector<8x256xbf16>
    %c0_20 = arith.constant 0 : index
    %c0_21 = arith.constant 0 : index
    %29 = vector.load %arg9[%c0_20, %c0_21] : memref<256x1024xbf16, #tpu.memory_space<vmem>>, vector<256x1024xbf16>
    %cst_22 = arith.constant dense<0.000000e+00> : vector<8x1024xf32>
    %30 = tpu.matmul %28, %29, %cst_22 {dimension_numbers = #tpu.dot_dimension_numbers<[1], [0], [0], [1], [0, 0, 1, 1], [], []>} : vector<8x256xbf16>, vector<256x1024xbf16>, vector<8x1024xf32> -> vector<8x1024xf32>
    %c0_23 = arith.constant 0 : index
    %c0_24 = arith.constant 0 : index
    %31 = vector.load %arg10[%c0_23, %c0_24] : memref<1x1024xf32, #tpu.memory_space<vmem>>, vector<1x1024xf32>
    %32 = vector.broadcast %31 : vector<1x1024xf32> to vector<8x1024xf32>
    %33 = arith.addf %30, %32 : vector<8x1024xf32>
    %cst_25 = arith.constant 0.000000e+00 : f32
    %34 = vector.broadcast %cst_25 : f32 to vector<8x1024xf32>
    %35 = arith.maximumf %33, %34 : vector<8x1024xf32>
    %c0_26 = arith.constant 0 : index
    %c0_27 = arith.constant 0 : index
    %36 = vector.load %arg11[%c0_26, %c0_27] : memref<8x1024xf32, #tpu.memory_space<vmem>>, vector<8x1024xf32>
    tpu.vector_store %arg11[%c0_26, %c0_27], %35 {strides = array<i32>} : memref<8x1024xf32, #tpu.memory_space<vmem>>, vector<8x1024xf32>,
    return
  }
  func.func @transform_0(%arg0: i32) -> (i32, i32) {
    %c0_i32 = arith.constant 0 : i32
    %c0_i32_0 = arith.constant 0 : i32
    return %arg0, %c0_i32 : i32, i32
  }
  func.func @transform_1(%arg0: i32) -> (i32, i32) {
    %c0_i32 = arith.constant 0 : i32
    %c0_i32_0 = arith.constant 0 : i32
    %c0_i32_1 = arith.constant 0 : i32
    return %c0_i32, %c0_i32_0 : i32, i32
  }
  func.func @transform_2(%arg0: i32) -> (i32, i32) {
    %c0_i32 = arith.constant 0 : i32
    %c0_i32_0 = arith.constant 0 : i32
    %c0_i32_1 = arith.constant 0 : i32
    return %c0_i32, %c0_i32_0 : i32, i32
  }
  func.func @transform_3(%arg0: i32) -> (i32, i32) {
    %c0_i32 = arith.constant 0 : i32
    %c0_i32_0 = arith.constant 0 : i32
    %c0_i32_1 = arith.constant 0 : i32
    return %c0_i32, %c0_i32_0 : i32, i32
  }
  func.func @transform_4(%arg0: i32) -> (i32, i32) {
    %c0_i32 = arith.constant 0 : i32
    %c0_i32_0 = arith.constant 0 : i32
    %c0_i32_1 = arith.constant 0 : i32
    return %c0_i32, %c0_i32_0 : i32, i32
  }
  func.func @transform_5(%arg0: i32) -> (i32, i32) {
    %c0_i32 = arith.constant 0 : i32
    %c0_i32_0 = arith.constant 0 : i32
    %c0_i32_1 = arith.constant 0 : i32
    return %c0_i32, %c0_i32_0 : i32, i32
  }
  func.func @transform_6(%arg0: i32) -> (i32, i32) {
    %c0_i32 = arith.constant 0 : i32
    %c0_i32_0 = arith.constant 0 : i32
    %c0_i32_1 = arith.constant 0 : i32
    return %c0_i32, %c0_i32_0 : i32, i32
  }
  func.func @transform_7(%arg0: i32) -> (i32, i32) {
    %c0_i32 = arith.constant 0 : i32
    %c0_i32_0 = arith.constant 0 : i32
    %c0_i32_1 = arith.constant 0 : i32
    return %c0_i32, %c0_i32_0 : i32, i32
  }
  func.func @transform_8(%arg0: i32) -> (i32, i32) {
    %c0_i32 = arith.constant 0 : i32
    %c0_i32_0 = arith.constant 0 : i32
    %c0_i32_1 = arith.constant 0 : i32
    return %c0_i32, %c0_i32_0 : i32, i32
  }
  func.func @transform_9(%arg0: i32) -> (i32, i32) {
    %c0_i32 = arith.constant 0 : i32
    %c0_i32_0 = arith.constant 0 : i32
    %c0_i32_1 = arith.constant 0 : i32
    return %c0_i32, %c0_i32_0 : i32, i32
  }
  func.func @transform_10(%arg0: i32) -> (i32, i32) {
    %c0_i32 = arith.constant 0 : i32
    %c0_i32_0 = arith.constant 0 : i32
    return %arg0, %c0_i32 : i32, i32
  }
}

</mosaic_0001>

<bundles_post_ra>
// kernel: tpu_custom_call.1
= control target key start
LH: loop header
LB: loop body
LE: loop exit
PB: predicated region body
PF: predicated region fallthrough
CT: control target
= control target key end

     0   :  { %15 = vsyncpa [#allocation3], 0  ;;  %s3235_s0 = inlined_call_operand.hbm [shape: f32[8,1024], index: 0, kind: input, shape index: {}]   ;;  %s3236_s1 = inlined_call_operand.hbm [shape: bf16[1024,256], index: 1, kind: input, shape index: {}]   ;;  %s3237_s2 = inlined_call_operand.vmem [shape: f32[1,256], index: 2, kind: input, shape index: {}]   ;;  %s3238_s3 = inlined_call_operand.hbm [shape: bf16[256,128], index: 3, kind: input, shape index: {}]   ;;  %s3239_s4 = inlined_call_operand.vmem [shape: f32[1,128], index: 4, kind: input, shape index: {}]   ;;  %s3240_s5 = inlined_call_operand.vmem [shape: f32[1,128], index: 5, kind: input, shape index: {}]   ;;  %s3241_s6 = inlined_call_operand.hbm [shape: bf16[128,256], index: 6, kind: input, shape index: {}]   ;;  %s3242_s7 = inlined_call_operand.vmem [shape: f32[1,256], index: 7, kind: input, shape index: {}]   ;;  %s3243_s8 = inlined_call_operand.hbm [shape: bf16[256,1024], index: 8, kind: input, shape index: {}]   ;;  %s3244_s9 = inlined_call_operand.vmem [shape: f32[1,1024], index: 9, kind: input, shape index: {}]   ;;  %s3245_s10 = inlined_call_operand.hbm [shape: f32[8,1024], index: 10, kind: output, shape index: {}]  }
   0x1   :  { %16 = vsyncpa [#allocation6], 0 }
   0x2   :  { %17 = vsyncpa [#allocation9], 0 }
   0x3   :  { %18 = vsyncpa [#allocation4], 0  ;;  %s3097_s13 = smov [#allocation5]  }
   0x4   :  { %s34_s14 = sshll.u32 %s3097_s13, 4  ;;  %s35_s14 = int_to_ptr.vmem [resolvable:$true] %s34_s14 }
   0x5   :  { %s2977_s15 = scalar_lea.vmem %s35_s14, 16384  ;;  %p2982_p1 = scmp.lt.s32.totalorder %s35_s14, %s35_s14 }
   0x6   :  { %p2978_p0 = scmp.ne.s32.totalorder %s35_s14, %s2977_s15  ;;  %p2983_p2 = scmp.lt.s32.totalorder %s2977_s15, %s2977_s15 }
   0x8   :  { %p2984_p3 = por %p2983_p2, %p2982_p1 }
   0xa   :  { %p2985_p4 = pnand %p2984_p3, %p2978_p0 }
   0xc   :  { %2988 = shalt.err (!%p2985_p4)
}
   0xd   :  { %s3098_s16 = smov 128   ;;  %s3099_s17 = smov 8  }
   0xe   :  { %40 = dma.hbm_to_vmem [thread:$0]  %s3236_s1, 16384, %s35_s14, [#allocation6], %s3098_s16, %s3098_s16, %s3099_s17  }
   0xf   :  { %s3100_s20 = smov [#allocation8]   ;;  %s3101_s22 = smov [#allocation2]  }
  0x10   :  { %s64_s21 = sshll.u32 %s3100_s20, 4  ;;  %s25_s23 = sshll.u32 %s3101_s22, 4  ;;  %s65_s21 = int_to_ptr.vmem [resolvable:$true] %s64_s21  ;;  %s26_s23 = int_to_ptr.vmem [resolvable:$true] %s25_s23 }
  0x11   :  { %s2997_s24 = scalar_lea.vmem %s65_s21, 2048  ;;  %p3002_p6 = scmp.lt.s32.totalorder %s65_s21, %s65_s21 }
  0x12   :  { %p2998_p5 = scmp.ne.s32.totalorder %s65_s21, %s2997_s24  ;;  %p3003_p7 = scmp.lt.s32.totalorder %s2997_s24, %s2997_s24 }
  0x14   :  { %p3004_p8 = por %p3003_p7, %p3002_p6 }
  0x16   :  { %p3005_p9 = pnand %p3004_p8, %p2998_p5 }
  0x18   :  { %3008 = shalt.err (!%p3005_p9)
}
  0x19   :  { %70 = dma.hbm_to_vmem [thread:$0]  %s3241_s6, 2048, %s65_s21, [#allocation9], %s3098_s16, %s3098_s16, %s3099_s17  }
  0x1a   :  { %s3017_s27 = scalar_lea.vmem %s26_s23, 1024  ;;  %p3022_p11 = scmp.lt.s32.totalorder %s26_s23, %s26_s23 }
  0x1b   :  { %p3018_p10 = scmp.ne.s32.totalorder %s26_s23, %s3017_s27  ;;  %p3023_p12 = scmp.lt.s32.totalorder %s3017_s27, %s3017_s27 }
  0x1d   :  { %p3024_p13 = por %p3023_p12, %p3022_p11 }
  0x1f   :  { %p3025_p0 = pnand %p3024_p13, %p3018_p10 }
  0x21   :  { %3028 = shalt.err (!%p3025_p0)
}
  0x22   :  { %28 = dma.hbm_to_vmem [thread:$0]  %s3235_s0, 1024, %s26_s23, [#allocation3]  }
  0x23   :  { %s3102_s29 = smov [#allocation7]  }
  0x24   :  { %s48_s30 = sshll.u32 %s3102_s29, 4  ;;  %s49_s30 = int_to_ptr.vmem [resolvable:$true] %s48_s30 }
  0x25   :  { %s3037_s11 = scalar_lea.vmem %s49_s30, 2048  ;;  %p3042_p2 = scmp.lt.s32.totalorder %s49_s30, %s49_s30 }
  0x26   :  { %p3038_p1 = scmp.ne.s32.totalorder %s49_s30, %s3037_s11  ;;  %p3043_p3 = scmp.lt.s32.totalorder %s3037_s11, %s3037_s11 }
  0x28   :  { %p3044_p4 = por %p3043_p3, %p3042_p2 }
  0x2a   :  { %p3045_p5 = pnand %p3044_p4, %p3038_p1 }
  0x2c   :  { %3048 = shalt.err (!%p3045_p5)
}
  0x2d   :  { %s3103_s6 = smov 64   ;;  %s3104_s12 = smov 4  }
  0x2e   :  { %54 = dma.hbm_to_vmem [thread:$0]  %s3238_s3, 2048, %s49_s30, [#allocation6], %s3103_s6, %s3103_s6, %s3104_s12  }
  0x2f   :  { %s3105_s15 = smov [#allocation10]  }
  0x30   :  { %s78_s16 = sshll.u32 %s3105_s15, 4  ;;  %s79_s16 = int_to_ptr.vmem [resolvable:$true] %s78_s16 }
  0x31   :  { %s3057_s0 = scalar_lea.vmem %s79_s16, 16384  ;;  %p3062_p7 = scmp.lt.s32.totalorder %s79_s16, %s79_s16 }
  0x32   :  { %p3058_p6 = scmp.ne.s32.totalorder %s79_s16, %s3057_s0  ;;  %p3063_p8 = scmp.lt.s32.totalorder %s3057_s0, %s3057_s0 }
  0x34   :  { %p3064_p9 = por %p3063_p8, %p3062_p7 }
  0x36   :  { %p3065_p10 = pnand %p3064_p9, %p3058_p6 }
  0x38   :  { %3068 = shalt.err (!%p3065_p10)
}
  0x39   :  { %s3106_s17 = smov 512   ;;  %s3107_s18 = smov 32  }
  0x3a   :  { %84 = dma.hbm_to_vmem [thread:$0]  %s3243_s8, 16384, %s79_s16, [#allocation9], %s3106_s17, %s3106_s17, %s3107_s18  }
  0x3b   :  { %3089 = dma.done.wait [#allocation3], 1024  }
  0x3c   :  { %3090 = vsyncadd [#allocation3], 4294966272 }
  0x3d   :  { %3091 = dma.done.wait [#allocation6], 18432  }
  0x3e   :  { %3092 = vsyncadd [#allocation6], 4294948864 }
  0x3f   :  { %3093 = dma.done.wait [#allocation9], 18432  }
  0x40   :  { %3094 = vsyncadd [#allocation9], 4294948864  ;;  %v2737_v0 = vld [vmem:[#allocation5 + $0x74] ss:$8 sps:$4 sm:$0xff]   ;;  %v2741_v2 = vld [vmem:[#allocation5 + $0x70] ss:$8 sps:$4 sm:$0xff]  }
  0x41   :  { %v2739_v1 = vld [vmem:[#allocation5 + $0x174] ss:$8 sps:$4 sm:$0xff]   ;;  %899 = vmatprep.subr.bf16.mxu0 %v2737_v0  ;;  %v2742_v3 = vld [vmem:[#allocation5 + $0x170] ss:$8 sps:$4 sm:$0xff]   ;;  %v2743_v4 = vld [vmem:[#allocation5 + $0x64] ss:$8 sps:$4 sm:$0xff]  }
  0x42   :  { %940 = vmatprep.subr.bf16.mxu1 %v2739_v1  ;;  %900 = vmatpush1.bf16.msra.mxu0 %v2741_v2  ;;  %v2745_v5 = vld [vmem:[#allocation5 + $0x164] ss:$8 sps:$4 sm:$0xff]   ;;  %v2747_v6 = vld [vmem:[#allocation5 + $0x60] ss:$8 sps:$4 sm:$0xff]   ;;  %v2749_v8 = vld [vmem:[#allocation5 + $0x54] ss:$8 sps:$4 sm:$0xff]  }
  0x43   :  { %941 = vmatpush1.bf16.msra.mxu1 %v2742_v3  ;;  %901 = vmatprep.subr.bf16.mxu0 %v2743_v4  ;;  %v2748_v7 = vld [vmem:[#allocation5 + $0x160] ss:$8 sps:$4 sm:$0xff]   ;;  %v2751_v9 = vld [vmem:[#allocation5 + $0x154] ss:$8 sps:$4 sm:$0xff]   ;;  %v2753_v10 = vld [vmem:[#allocation5 + $0x50] ss:$8 sps:$4 sm:$0xff]  }
  0x44   :  { %942 = vmatprep.subr.bf16.mxu1 %v2745_v5  ;;  %v2754_v11 = vld [vmem:[#allocation5 + $0x150] ss:$8 sps:$4 sm:$0xff]   ;;  %v2755_v12 = vld [vmem:[#allocation5 + $0x44] ss:$8 sps:$4 sm:$0xff]   ;;  %v2759_v14 = vld [vmem:[#allocation5 + $0x40] ss:$8 sps:$4 sm:$0xff]  }
  0x45   :  { %v2757_v13 = vld [vmem:[#allocation5 + $0x144] ss:$8 sps:$4 sm:$0xff]   ;;  %v2760_v15 = vld [vmem:[#allocation5 + $0x140] ss:$8 sps:$4 sm:$0xff]   ;;  %v2761_v16 = vld [vmem:[#allocation5 + $0x34] ss:$8 sps:$4 sm:$0xff]  }
  0x46   :  { %902 = vmatpush1.bf16.msra.mxu0 %v2747_v6  ;;  %v2763_v17 = vld [vmem:[#allocation5 + $0x134] ss:$8 sps:$4 sm:$0xff]   ;;  %v2765_v18 = vld [vmem:[#allocation5 + $0x30] ss:$8 sps:$4 sm:$0xff]   ;;  %v2767_v20 = vld [vmem:[#allocation5 + $0x24] ss:$8 sps:$4 sm:$0xff]  }
  0x47   :  { %943 = vmatpush1.bf16.msra.mxu1 %v2748_v7  ;;  %903 = vmatprep.subr.bf16.mxu0 %v2749_v8  ;;  %v2766_v19 = vld [vmem:[#allocation5 + $0x130] ss:$8 sps:$4 sm:$0xff]   ;;  %v2769_v21 = vld [vmem:[#allocation5 + $0x124] ss:$8 sps:$4 sm:$0xff]   ;;  %v2771_v22 = vld [vmem:[#allocation5 + $0x20] ss:$8 sps:$4 sm:$0xff]  }
  0x48   :  { %944 = vmatprep.subr.bf16.mxu1 %v2751_v9  ;;  %v2772_v23 = vld [vmem:[#allocation5 + $0x120] ss:$8 sps:$4 sm:$0xff]   ;;  %v2773_v24 = vld [vmem:[#allocation5 + $0x14] ss:$8 sps:$4 sm:$0xff]   ;;  %v2777_v26 = vld [vmem:[#allocation5 + $0x10] ss:$8 sps:$4 sm:$0xff]  }
  0x49   :  { %v2775_v25 = vld [vmem:[#allocation5 + $0x114] ss:$8 sps:$4 sm:$0xff]   ;;  %v2778_v27 = vld [vmem:[#allocation5 + $0x110] ss:$8 sps:$4 sm:$0xff]   ;;  %v2779_v28 = vld [vmem:[#allocation5 + $0x4] ss:$8 sps:$4 sm:$0xff]  }
  0x4a   :  { %904 = vmatpush1.bf16.msra.mxu0 %v2753_v10  ;;  %v2781_v29 = vld [vmem:[#allocation5 + $0x104] ss:$8 sps:$4 sm:$0xff]   ;;  %v2783_v30 = vld [vmem:[#allocation5] ss:$8 sps:$4 sm:$0xff]   ;;  %v2785_v32 = vld [vmem:[#allocation5 + $0xf4] ss:$8 sps:$4 sm:$0xff]  }
  0x4b   :  { %945 = vmatpush1.bf16.msra.mxu1 %v2754_v11  ;;  %905 = vmatprep.subr.bf16.mxu0 %v2755_v12  ;;  %v2784_v31 = vld [vmem:[#allocation5 + $0x100] ss:$8 sps:$4 sm:$0xff]   ;;  %v2787_v33 = vld [vmem:[#allocation5 + $0x1f4] ss:$8 sps:$4 sm:$0xff]   ;;  %v2789_v34 = vld [vmem:[#allocation5 + $0xf0] ss:$8 sps:$4 sm:$0xff]  }
  0x4c   :  { %946 = vmatprep.subr.bf16.mxu1 %v2757_v13  ;;  %v2790_v35 = vld [vmem:[#allocation5 + $0x1f0] ss:$8 sps:$4 sm:$0xff]   ;;  %v2791_v36 = vld [vmem:[#allocation5 + $0xe4] ss:$8 sps:$4 sm:$0xff]   ;;  %v2795_v38 = vld [vmem:[#allocation5 + $0xe0] ss:$8 sps:$4 sm:$0xff]  }
  0x4d   :  { %v2793_v37 = vld [vmem:[#allocation5 + $0x1e4] ss:$8 sps:$4 sm:$0xff]   ;;  %v2796_v39 = vld [vmem:[#allocation5 + $0x1e0] ss:$8 sps:$4 sm:$0xff]   ;;  %v2797_v40 = vld [vmem:[#allocation5 + $0xd4] ss:$8 sps:$4 sm:$0xff]  }
  0x4e   :  { %906 = vmatpush1.bf16.msra.mxu0 %v2759_v14  ;;  %v2799_v41 = vld [vmem:[#allocation5 + $0x1d4] ss:$8 sps:$4 sm:$0xff]   ;;  %v2801_v42 = vld [vmem:[#allocation5 + $0xd0] ss:$8 sps:$4 sm:$0xff]   ;;  %v2803_v44 = vld [vmem:[#allocation5 + $0xc4] ss:$8 sps:$4 sm:$0xff]  }
  0x4f   :  { %947 = vmatpush1.bf16.msra.mxu1 %v2760_v15  ;;  %907 = vmatprep.subr.bf16.mxu0 %v2761_v16  ;;  %v2802_v43 = vld [vmem:[#allocation5 + $0x1d0] ss:$8 sps:$4 sm:$0xff]   ;;  %v2805_v45 = vld [vmem:[#allocation5 + $0x1c4] ss:$8 sps:$4 sm:$0xff]   ;;  %v2807_v47 = vld [vmem:[#allocation5 + $0xc0] ss:$8 sps:$4 sm:$0xff]  }
  0x50   :  { %948 = vmatprep.subr.bf16.mxu1 %v2763_v17  ;;  %v104_v46 = vld [vmem:[#allocation2 + $0x8] sm:$0xff]  ;;  %v106_v50 = vld [vmem:[#allocation2 + $0x18] sm:$0xff]  ;;  %v103_v4 = vld [vmem:[#allocation2] sm:$0xff] }
  0x51   :  { %v2808_v48 = vld [vmem:[#allocation5 + $0x1c0] ss:$8 sps:$4 sm:$0xff]   ;;  %v112_v49 = vpack.c.bf16 %v104_v46, %v104_v46  ;;  %v2809_v51 = vld [vmem:[#allocation5 + $0xb4] ss:$8 sps:$4 sm:$0xff]   ;;  %v114_v52 = vpack.c.bf16 %v106_v50, %v106_v50  ;;  %v2813_v54 = vld [vmem:[#allocation5 + $0xb0] ss:$8 sps:$4 sm:$0xff]   ;;  %v111_v8 = vpack.c.bf16 %v103_v4, %v103_v4 }
  0x52   :  { %908 = vmatpush1.bf16.msra.mxu0 %v2765_v18  ;;  %v2811_v53 = vld [vmem:[#allocation5 + $0x1b4] ss:$8 sps:$4 sm:$0xff]   ;;  %v2814_v55 = vld [vmem:[#allocation5 + $0x1b0] ss:$8 sps:$4 sm:$0xff]   ;;  %v2815_v56 = vld [vmem:[#allocation5 + $0xa4] ss:$8 sps:$4 sm:$0xff]  }
  0x53   :  { %949 = vmatpush1.bf16.msra.mxu1 %v2766_v19  ;;  %909 = vmatprep.subr.bf16.mxu0 %v2767_v20  ;;  %v2817_v57 = vld [vmem:[#allocation5 + $0x1a4] ss:$8 sps:$4 sm:$0xff]   ;;  %v2819_v58 = vld [vmem:[#allocation5 + $0xa0] ss:$8 sps:$4 sm:$0xff]   ;;  %v2821_v60 = vld [vmem:[#allocation5 + $0x94] ss:$8 sps:$4 sm:$0xff]  }
  0x54   :  { %950 = vmatprep.subr.bf16.mxu1 %v2769_v21  ;;  %931 = vmatprep.mubr.bf16.mxu0 %v112_v49  ;;  %v2820_v59 = vld [vmem:[#allocation5 + $0x1a0] ss:$8 sps:$4 sm:$0xff]   ;;  %v2823_v61 = vld [vmem:[#allocation5 + $0x194] ss:$8 sps:$4 sm:$0xff]   ;;  %v2825_v62 = vld [vmem:[#allocation5 + $0x90] ss:$8 sps:$4 sm:$0xff]  }
  0x55   :  { %972 = vmatprep.mubr.bf16.mxu1 %v114_v52  ;;  %v2826_v63 = vld [vmem:[#allocation5 + $0x190] ss:$8 sps:$4 sm:$0xff]   ;;  %v2827_v0 = vld [vmem:[#allocation5 + $0x84] ss:$8 sps:$4 sm:$0xff]   ;;  %v2831_v2 = vld [vmem:[#allocation5 + $0x80] ss:$8 sps:$4 sm:$0xff]  }
  0x56   :  { %910 = vmatpush1.bf16.msra.mxu0 %v2771_v22  ;;  %v2829_v1 = vld [vmem:[#allocation5 + $0x184] ss:$8 sps:$4 sm:$0xff]   ;;  %v2832_v3 = vld [vmem:[#allocation5 + $0x180] ss:$8 sps:$4 sm:$0xff]   ;;  %v105_v5 = vld [vmem:[#allocation2 + $0x10] sm:$0xff] }
  0x57   :  { %951 = vmatpush1.bf16.msra.mxu1 %v2772_v23  ;;  %911 = vmatprep.subr.bf16.mxu0 %v2773_v24  ;;  %v2835_v6 = vld [vmem:[#allocation5 + $0x274] ss:$8 sps:$4 sm:$0xff]   ;;  %v113_v9 = vpack.c.bf16 %v105_v5, %v105_v5  ;;  %v2833_v10 = vld [vmem:[#allocation5 + $0x270] ss:$8 sps:$4 sm:$0xff]   ;;  %v2841_v12 = vld [vmem:[#allocation5 + $0x264] ss:$8 sps:$4 sm:$0xff]  }
  0x58   :  { %952 = vmatprep.subr.bf16.mxu1 %v2775_v25  ;;  %v2838_v7 = vld [vmem:[#allocation5 + $0x374] ss:$8 sps:$4 sm:$0xff]   ;;  %v2836_v11 = vld [vmem:[#allocation5 + $0x370] ss:$8 sps:$4 sm:$0xff]   ;;  %v2844_v13 = vld [vmem:[#allocation5 + $0x364] ss:$8 sps:$4 sm:$0xff]  }
  0x59   :  { %v2839_v14 = vld [vmem:[#allocation5 + $0x260] ss:$8 sps:$4 sm:$0xff]   ;;  %v2847_v16 = vld [vmem:[#allocation5 + $0x254] ss:$8 sps:$4 sm:$0xff]   ;;  %v2845_v18 = vld [vmem:[#allocation5 + $0x250] ss:$8 sps:$4 sm:$0xff]  }
  0x5a   :  { %912 = vmatpush1.bf16.msra.mxu0 %v2777_v26  ;;  %v2842_v15 = vld [vmem:[#allocation5 + $0x360] ss:$8 sps:$4 sm:$0xff]   ;;  %v2850_v17 = vld [vmem:[#allocation5 + $0x354] ss:$8 sps:$4 sm:$0xff]   ;;  %v2848_v19 = vld [vmem:[#allocation5 + $0x350] ss:$8 sps:$4 sm:$0xff]  }
  0x5b   :  { %953 = vmatpush1.bf16.msra.mxu1 %v2778_v27  ;;  %913 = vmatprep.subr.bf16.mxu0 %v2779_v28  ;;  %v2853_v20 = vld [vmem:[#allocation5 + $0x244] ss:$8 sps:$4 sm:$0xff]   ;;  %v2851_v22 = vld [vmem:[#allocation5 + $0x240] ss:$8 sps:$4 sm:$0xff]   ;;  %v2859_v24 = vld [vmem:[#allocation5 + $0x234] ss:$8 sps:$4 sm:$0xff]  }
  0x5c   :  { %954 = vmatprep.subr.bf16.mxu1 %v2781_v29  ;;  %v2856_v21 = vld [vmem:[#allocation5 + $0x344] ss:$8 sps:$4 sm:$0xff]   ;;  %v2854_v23 = vld [vmem:[#allocation5 + $0x340] ss:$8 sps:$4 sm:$0xff]   ;;  %v2862_v25 = vld [vmem:[#allocation5 + $0x334] ss:$8 sps:$4 sm:$0xff]  }
  0x5d   :  { %v2857_v26 = vld [vmem:[#allocation5 + $0x230] ss:$8 sps:$4 sm:$0xff]   ;;  %v2865_v28 = vld [vmem:[#allocation5 + $0x224] ss:$8 sps:$4 sm:$0xff]   ;;  %v2887_v50 = vld [vmem:[#allocation5 + $0x2e0] ss:$8 sps:$4 sm:$0xff]  }
  0x5e   :  { %914 = vmatpush1.bf16.msra.mxu0 %v2783_v30  ;;  %v2860_v27 = vld [vmem:[#allocation5 + $0x330] ss:$8 sps:$4 sm:$0xff]   ;;  %v2868_v29 = vld [vmem:[#allocation5 + $0x324] ss:$8 sps:$4 sm:$0xff]   ;;  %v2863_v30 = vld [vmem:[#allocation5 + $0x220] ss:$8 sps:$4 sm:$0xff]  }
  0x5f   :  { %955 = vmatpush1.bf16.msra.mxu1 %v2784_v31  ;;  %915 = vmatprep.subr.bf16.mxu0 %v2785_v32  ;;  %v2866_v31 = vld [vmem:[#allocation5 + $0x320] ss:$8 sps:$4 sm:$0xff]   ;;  %v2871_v32 = vld [vmem:[#allocation5 + $0x214] ss:$8 sps:$4 sm:$0xff]   ;;  %v2881_v46 = vld [vmem:[#allocation5 + $0x2f0] ss:$8 sps:$4 sm:$0xff]  }
  0x60   :  { %956 = vmatprep.subr.bf16.mxu1 %v2787_v33  ;;  %v2874_v33 = vld [vmem:[#allocation5 + $0x314] ss:$8 sps:$4 sm:$0xff]   ;;  %v2892_v49 = vld [vmem:[#allocation5 + $0x3e4] ss:$8 sps:$4 sm:$0xff]  }
  0x61   :  { %v2895_v52 = vld [vmem:[#allocation5 + $0x2d4] ss:$8 sps:$4 sm:$0xff]  }
  0x62   :  { %916 = vmatpush2.bf16.msra.mxu0 %v2789_v34  ;;  %v2869_v34 = vld [vmem:[#allocation5 + $0x210] ss:$8 sps:$4 sm:$0xff]   ;;  %v2919_v4 = vld [vmem:[#allocation5 + $0x294] ss:$8 sps:$4 sm:$0xff]  }
  0x63   :  { %957 = vmatpush2.bf16.msra.mxu1 %v2790_v35  ;;  %917 = vmatprep.subr.bf16.mxu0 %v2791_v36  ;;  %v108_v35 = vld [vmem:[#allocation2 + $0x28] sm:$0xff]  ;;  %v2872_v36 = vld [vmem:[#allocation5 + $0x310] ss:$8 sps:$4 sm:$0xff]   ;;  %v2922_v5 = vld [vmem:[#allocation5 + $0x394] ss:$8 sps:$4 sm:$0xff]  }
  0x64   :  { %958 = vmatprep.subr.bf16.mxu1 %v2793_v37  ;;  %v2877_v37 = vld [vmem:[#allocation5 + $0x204] ss:$8 sps:$4 sm:$0xff]  }
  0x66   :  { %918 = vmatpush2.bf16.msra.mxu0 %v2795_v38  ;;  %v116_v38 = vpack.c.bf16 %v108_v35, %v108_v35  ;;  %v2948_v35 = vld [vmem:[#allocation8 + $0x60] ss:$8 sps:$4 sm:$0xff]  }
  0x67   :  { %959 = vmatpush2.bf16.msra.mxu1 %v2796_v39  ;;  %919 = vmatprep.subr.bf16.mxu0 %v2797_v40  ;;  %v110_v39 = vld [vmem:[#allocation2 + $0x38] sm:$0xff]  ;;  %v2880_v40 = vld [vmem:[#allocation5 + $0x304] ss:$8 sps:$4 sm:$0xff]  }
  0x68   :  { %960 = vmatprep.subr.bf16.mxu1 %v2799_v41  ;;  %v118_v41 = vpack.c.bf16 %v110_v39, %v110_v39  ;;  %v2954_v39 = vld [vmem:[#allocation8 + $0x40] ss:$8 sps:$4 sm:$0xff]  }
  0x6a   :  { %920 = vmatpush2.bf16.msra.mxu0 %v2801_v42  ;;  %v2875_v42 = vld [vmem:[#allocation5 + $0x200] ss:$8 sps:$4 sm:$0xff]  }
  0x6b   :  { %961 = vmatpush2.bf16.msra.mxu1 %v2802_v43  ;;  %921 = vmatprep.subr.bf16.mxu0 %v2803_v44  ;;  %v2878_v43 = vld [vmem:[#allocation5 + $0x300] ss:$8 sps:$4 sm:$0xff]   ;;  %v2883_v44 = vld [vmem:[#allocation5 + $0x2f4] ss:$8 sps:$4 sm:$0xff]  }
  0x6c   :  { %962 = vmatprep.subr.bf16.mxu1 %v2805_v45  ;;  %v2886_v45 = vld [vmem:[#allocation5 + $0x3f4] ss:$8 sps:$4 sm:$0xff]  }
  0x6e   :  { %922 = vmatpush2.bf16.msra.mxu0 %v2807_v47  ;;  %v2884_v47 = vld [vmem:[#allocation5 + $0x3f0] ss:$8 sps:$4 sm:$0xff]  }
  0x6f   :  { %963 = vmatpush2.bf16.msra.mxu1 %v2808_v48  ;;  %923 = vmatprep.subr.bf16.mxu0 %v2809_v51  ;;  %v2889_v48 = vld [vmem:[#allocation5 + $0x2e4] ss:$8 sps:$4 sm:$0xff]   ;;  %v2890_v51 = vld [vmem:[#allocation5 + $0x3e0] ss:$8 sps:$4 sm:$0xff]  }
  0x70   :  { %964 = vmatprep.subr.bf16.mxu1 %v2811_v53  ;;  %v2898_v53 = vld [vmem:[#allocation5 + $0x3d4] ss:$8 sps:$4 sm:$0xff]  }
  0x72   :  { %924 = vmatpush2.bf16.msra.mxu0 %v2813_v54  ;;  %v2893_v54 = vld [vmem:[#allocation5 + $0x2d0] ss:$8 sps:$4 sm:$0xff]  }
  0x73   :  { %965 = vmatpush2.bf16.msra.mxu1 %v2814_v55  ;;  %925 = vmatprep.subr.bf16.mxu0 %v2815_v56  ;;  %v2896_v55 = vld [vmem:[#allocation5 + $0x3d0] ss:$8 sps:$4 sm:$0xff]   ;;  %v2901_v56 = vld [vmem:[#allocation5 + $0x2c4] ss:$8 sps:$4 sm:$0xff]  }
  0x74   :  { %966 = vmatprep.subr.bf16.mxu1 %v2817_v57  ;;  %v2904_v57 = vld [vmem:[#allocation5 + $0x3c4] ss:$8 sps:$4 sm:$0xff]  }
  0x76   :  { %926 = vmatpush2.bf16.msra.mxu0 %v2819_v58  ;;  %v2899_v58 = vld [vmem:[#allocation5 + $0x2c0] ss:$8 sps:$4 sm:$0xff]  }
  0x77   :  { %967 = vmatpush2.bf16.msra.mxu1 %v2820_v59  ;;  %927 = vmatprep.subr.bf16.mxu0 %v2821_v60  ;;  %v2902_v59 = vld [vmem:[#allocation5 + $0x3c0] ss:$8 sps:$4 sm:$0xff]   ;;  %v2907_v60 = vld [vmem:[#allocation5 + $0x2b4] ss:$8 sps:$4 sm:$0xff]  }
  0x78   :  { %968 = vmatprep.subr.bf16.mxu1 %v2823_v61  ;;  %v2910_v61 = vld [vmem:[#allocation5 + $0x3b4] ss:$8 sps:$4 sm:$0xff]  }
  0x7a   :  { %928 = vmatpush2.bf16.msra.mxu0 %v2825_v62  ;;  %v2905_v62 = vld [vmem:[#allocation5 + $0x2b0] ss:$8 sps:$4 sm:$0xff]  }
  0x7b   :  { %969 = vmatpush2.bf16.msra.mxu1 %v2826_v63  ;;  %929 = vmatprep.subr.bf16.mxu0 %v2827_v0  ;;  %v2908_v63 = vld [vmem:[#allocation5 + $0x3b0] ss:$8 sps:$4 sm:$0xff]   ;;  %v2913_v0 = vld [vmem:[#allocation5 + $0x2a4] ss:$8 sps:$4 sm:$0xff]  }
  0x7c   :  { %970 = vmatprep.subr.bf16.mxu1 %v2829_v1  ;;  %v2916_v1 = vld [vmem:[#allocation5 + $0x3a4] ss:$8 sps:$4 sm:$0xff]  }
  0x7e   :  { %930 = vmatpush2.bf16.msra.mxu0 %v2831_v2  ;;  %v2911_v2 = vld [vmem:[#allocation5 + $0x2a0] ss:$8 sps:$4 sm:$0xff]  }
  0x7f   :  { %971 = vmatpush2.bf16.msra.mxu1 %v2832_v3  ;;  %981 = vmatprep.subr.bf16.mxu0 %v2835_v6  ;;  %v2914_v3 = vld [vmem:[#allocation5 + $0x3a0] ss:$8 sps:$4 sm:$0xff]   ;;  %v2917_v6 = vld [vmem:[#allocation5 + $0x290] ss:$8 sps:$4 sm:$0xff]  }
  0x80   :  { %1022 = vmatprep.subr.bf16.mxu1 %v2838_v7  ;;  %v2920_v7 = vld [vmem:[#allocation5 + $0x390] ss:$8 sps:$4 sm:$0xff]  }
  0x81   :  { %932 = vmatmul.mubr.bf16.vlgmr.msra.gmra.mxu0 %v111_v8  ;;  %v2925_v8 = vld [vmem:[#allocation5 + $0x284] ss:$8 sps:$4 sm:$0xff]  }
  0x82   :  { %973 = vmatmul.mubr.bf16.vlgmr.msra.gmra.mxu1 %v113_v9  ;;  %982 = vmatpush1.bf16.msra.mxu0 %v2833_v10  ;;  %v2928_v9 = vld [vmem:[#allocation5 + $0x384] ss:$8 sps:$4 sm:$0xff]   ;;  %v2923_v10 = vld [vmem:[#allocation5 + $0x280] ss:$8 sps:$4 sm:$0xff]  }
  0x83   :  { %1023 = vmatpush1.bf16.msra.mxu1 %v2836_v11  ;;  %983 = vmatprep.subr.bf16.mxu0 %v2841_v12  ;;  %v2926_v11 = vld [vmem:[#allocation5 + $0x380] ss:$8 sps:$4 sm:$0xff]  }
  0x84   :  { %1024 = vmatprep.subr.bf16.mxu1 %v2844_v13  ;;  %1013 = vmatprep.mubr.bf16.mxu0 %v116_v38  ;;  %v107_v12 = vld [vmem:[#allocation2 + $0x20] sm:$0xff]  ;;  %v109_v13 = vld [vmem:[#allocation2 + $0x30] sm:$0xff] }
  0x85   :  { %1054 = vmatprep.mubr.bf16.mxu1 %v118_v41  ;;  %v2956_v38 = vld [vmem:[#allocation8 + $0x44] ss:$8 sps:$4 sm:$0xff]   ;;  %v2957_v41 = vld [vmem:[#allocation8 + $0x30] ss:$8 sps:$4 sm:$0xff]  }
  0x86   :  { %984 = vmatpush1.bf16.msra.mxu0 %v2839_v14  ;;  %v115_v14 = vpack.c.bf16 %v107_v12, %v107_v12 }
  0x87   :  { %1025 = vmatpush1.bf16.msra.mxu1 %v2842_v15  ;;  %985 = vmatprep.subr.bf16.mxu0 %v2847_v16  ;;  %v117_v15 = vpack.c.bf16 %v109_v13, %v109_v13  ;;  %v2929_v16 = vld [vmem:[#allocation7 + $0x78] sm:$0xff]   ;;  %v2962_v13 = vld [vmem:[#allocation8 + $0x24] ss:$8 sps:$4 sm:$0xff]  }
  0x88   :  { %1026 = vmatprep.subr.bf16.mxu1 %v2850_v17  ;;  %v2930_v17 = vld [vmem:[#allocation7 + $0x38] sm:$0xff]  }
  0x8a   :  { %986 = vmatpush1.bf16.msra.mxu0 %v2845_v18  ;;  %v2931_v18 = vld [vmem:[#allocation7 + $0x70] sm:$0xff]  }
  0x8b   :  { %1027 = vmatpush1.bf16.msra.mxu1 %v2848_v19  ;;  %987 = vmatprep.subr.bf16.mxu0 %v2853_v20  ;;  %v2932_v19 = vld [vmem:[#allocation7 + $0x30] sm:$0xff]   ;;  %v2933_v20 = vld [vmem:[#allocation7 + $0x68] sm:$0xff]  }
  0x8c   :  { %1028 = vmatprep.subr.bf16.mxu1 %v2856_v21  ;;  %v2934_v21 = vld [vmem:[#allocation7 + $0x28] sm:$0xff]  }
  0x8e   :  { %988 = vmatpush1.bf16.msra.mxu0 %v2851_v22  ;;  %v2935_v22 = vld [vmem:[#allocation7 + $0x60] sm:$0xff]  }
  0x8f   :  { %1029 = vmatpush1.bf16.msra.mxu1 %v2854_v23  ;;  %989 = vmatprep.subr.bf16.mxu0 %v2859_v24  ;;  %v2936_v23 = vld [vmem:[#allocation7 + $0x20] sm:$0xff]   ;;  %v2937_v24 = vld [vmem:[#allocation7 + $0x58] sm:$0xff]  }
  0x90   :  { %1030 = vmatprep.subr.bf16.mxu1 %v2862_v25  ;;  %v2938_v25 = vld [vmem:[#allocation7 + $0x18] sm:$0xff]  }
  0x92   :  { %990 = vmatpush1.bf16.msra.mxu0 %v2857_v26  ;;  %v2939_v26 = vld [vmem:[#allocation7 + $0x50] sm:$0xff]  }
  0x93   :  { %1031 = vmatpush1.bf16.msra.mxu1 %v2860_v27  ;;  %991 = vmatprep.subr.bf16.mxu0 %v2865_v28  ;;  %v2940_v27 = vld [vmem:[#allocation7 + $0x10] sm:$0xff]   ;;  %v2941_v28 = vld [vmem:[#allocation7 + $0x48] sm:$0xff]  }
  0x94   :  { %1032 = vmatprep.subr.bf16.mxu1 %v2868_v29  ;;  %v2942_v29 = vld [vmem:[#allocation7 + $0x8] sm:$0xff]  }
  0x96   :  { %992 = vmatpush1.bf16.msra.mxu0 %v2863_v30  ;;  %v2943_v30 = vld [vmem:[#allocation7 + $0x40] sm:$0xff]  }
  0x97   :  { %1033 = vmatpush1.bf16.msra.mxu1 %v2866_v31  ;;  %993 = vmatprep.subr.bf16.mxu0 %v2871_v32  ;;  %v2944_v31 = vld [vmem:[#allocation7] sm:$0xff]   ;;  %v2945_v32 = vld [vmem:[#allocation8 + $0x70] ss:$8 sps:$4 sm:$0xff]  }
  0x98   :  { %1034 = vmatprep.subr.bf16.mxu1 %v2874_v33  ;;  %v2947_v33 = vld [vmem:[#allocation8 + $0x74] ss:$8 sps:$4 sm:$0xff]  }
  0x9a   :  { %994 = vmatpush1.bf16.msra.mxu0 %v2869_v34  ;;  %v2950_v34 = vld [vmem:[#allocation8 + $0x64] ss:$8 sps:$4 sm:$0xff]  }
  0x9b   :  { %1035 = vmatpush1.bf16.msra.mxu1 %v2872_v36  ;;  %995 = vmatprep.subr.bf16.mxu0 %v2877_v37  ;;  %v2953_v36 = vld [vmem:[#allocation8 + $0x54] ss:$8 sps:$4 sm:$0xff]   ;;  %v2951_v37 = vld [vmem:[#allocation8 + $0x50] ss:$8 sps:$4 sm:$0xff]  }
  0x9c   :  { %1036 = vmatprep.subr.bf16.mxu1 %v2880_v40  ;;  %v2959_v40 = vld [vmem:[#allocation8 + $0x34] ss:$8 sps:$4 sm:$0xff]  }
  0x9e   :  { %996 = vmatpush1.bf16.msra.mxu0 %v2875_v42 }
  0x9f   :  { %1037 = vmatpush1.bf16.msra.mxu1 %v2878_v43  ;;  %997 = vmatprep.subr.bf16.mxu0 %v2883_v44 }
  0xa0   :  { %1038 = vmatprep.subr.bf16.mxu1 %v2886_v45 }
  0xa2   :  { %998 = vmatpush2.bf16.msra.mxu0 %v2881_v46 }
  0xa3   :  { %1039 = vmatpush2.bf16.msra.mxu1 %v2884_v47  ;;  %999 = vmatprep.subr.bf16.mxu0 %v2889_v48 }
  0xa4   :  { %1040 = vmatprep.subr.bf16.mxu1 %v2892_v49 }
  0xa6   :  { %1000 = vmatpush2.bf16.msra.mxu0 %v2887_v50  ;;  %v249_v50 = vlaneseq }
  0xa7   :  { %1041 = vmatpush2.bf16.msra.mxu1 %v2890_v51  ;;  %1001 = vmatprep.subr.bf16.mxu0 %v2895_v52 }
  0xa8   :  { %1042 = vmatprep.subr.bf16.mxu1 %v2898_v53  ;;  %v3180_v51 = vshrl.u32 %v249_v50, 7  ;;  %v247_v53 = vld [vmem:[%s3237_s2] sm:$0x3] }
  0xaa   :  { %1002 = vmatpush2.bf16.msra.mxu0 %v2893_v54  ;;  %v3183_v52 = vsub.s32 0, %v3180_v51  ;;  %v3189_v54 = vsub.s32 1, %v3180_v51 }
  0xab   :  { %1043 = vmatpush2.bf16.msra.mxu1 %v2896_v55  ;;  %1003 = vmatprep.subr.bf16.mxu0 %v2901_v56 }
  0xac   :  { %1044 = vmatprep.subr.bf16.mxu1 %v2904_v57  ;;  %v252_v55 = vrot.slane %v247_v53, %v3183_v52  ;;  %v256_v56 = vrot.slane %v247_v53, %v3189_v54 }
  0xae   :  { %1004 = vmatpush2.bf16.msra.mxu0 %v2899_v58 }
  0xaf   :  { %1045 = vmatpush2.bf16.msra.mxu1 %v2902_v59  ;;  %1005 = vmatprep.subr.bf16.mxu0 %v2907_v60 }
  0xb0   :  { %1046 = vmatprep.subr.bf16.mxu1 %v2910_v61 }
  0xb2   :  { %1006 = vmatpush2.bf16.msra.mxu0 %v2905_v62 }
  0xb3   :  { %1047 = vmatpush2.bf16.msra.mxu1 %v2908_v63  ;;  %1007 = vmatprep.subr.bf16.mxu0 %v2913_v0 }
  0xb4   :  { %1048 = vmatprep.subr.bf16.mxu1 %v2916_v1 }
  0xb6   :  { %1008 = vmatpush2.bf16.msra.mxu0 %v2911_v2 }
  0xb7   :  { %1049 = vmatpush2.bf16.msra.mxu1 %v2914_v3  ;;  %1009 = vmatprep.subr.bf16.mxu0 %v2919_v4 }
  0xb8   :  { %1050 = vmatprep.subr.bf16.mxu1 %v2922_v5 }
  0xba   :  { %1010 = vmatpush2.bf16.msra.mxu0 %v2917_v6 }
  0xbb   :  { %1051 = vmatpush2.bf16.msra.mxu1 %v2920_v7  ;;  %1011 = vmatprep.subr.bf16.mxu0 %v2925_v8 }
  0xbc   :  { %1052 = vmatprep.subr.bf16.mxu1 %v2928_v9 }
  0xbe   :  { %1012 = vmatpush2.bf16.msra.mxu0 %v2923_v10 }
  0xbf   :  { %1053 = vmatpush2.bf16.msra.mxu1 %v2926_v11  ;;  %2702 = vmatprep.subr.bf16.mxu0 %v2929_v16  ;;  %v2963_v16 = vld [vmem:[#allocation8 + $0x10] ss:$8 sps:$4 sm:$0xff]  }
  0xc0   :  { %1360 = vmatprep.subr.bf16.mxu1 %v2947_v33  ;;  %v1449_v33 = vld [vmem:[#allocation10 + $0x160] sm:$0xff] }
  0xc1   :  { %1014 = vmatmul.mubr.bf16.vlgmr.msra.gmra.mxu0 %v115_v14  ;;  %v2960_v14 = vld [vmem:[#allocation8 + $0x20] ss:$8 sps:$4 sm:$0xff]  }
  0xc2   :  { %1055 = vmatmul.mubr.bf16.vlgmr.msra.gmra.mxu1 %v117_v15  ;;  %2703 = vmatpush3.bf16.msra.mxu0 %v2930_v17  ;;  %v2965_v15 = vld [vmem:[#allocation8 + $0x14] ss:$8 sps:$4 sm:$0xff]   ;;  %v2968_v17 = vld [vmem:[#allocation8 + $0x4] ss:$8 sps:$4 sm:$0xff]  }
  0xc3   :  { %2704 = vmatprep.subr.bf16.mxu0 %v2931_v18  ;;  %1361 = vmatpush1.bf16.msra.mxu1 %v2945_v32  ;;  %v2966_v18 = vld [vmem:[#allocation8] ss:$8 sps:$4 sm:$0xff]  }
  0xc4   :  { %1362 = vmatprep.subr.bf16.mxu1 %v2950_v34  ;;  %v1445_v32 = vld [vmem:[#allocation10 + $0x140] sm:$0xff] }
  0xc5   :  { %v2615_v34 = vcombine.high %v1445_v32, %v1449_v33 }
  0xc6   :  { %2705 = vmatpush3.bf16.msra.mxu0 %v2932_v19  ;;  %v3108_v19 = vmov 0  }
  0xc7   :  { %2706 = vmatprep.subr.bf16.mxu0 %v2933_v20  ;;  %1363 = vmatpush1.bf16.msra.mxu1 %v2948_v35  ;;  %v1461_v20 = vld [vmem:[#allocation10 + $0x1c0] sm:$0xff]  ;;  %v2614_v35 = vcombine.low %v1445_v32, %v1449_v33  ;;  %v1458_v32 = vld [vmem:[#allocation10 + $0x1a8] sm:$0xff] }
  0xc8   :  { %1364 = vmatprep.subr.bf16.mxu1 %v2953_v36  ;;  %1392 = vmatprep.mubr.bf16.mxu1 %v3108_v19  ;;  %v1437_v36 = vld [vmem:[#allocation10 + $0x100] sm:$0xff] }
  0xca   :  { %2707 = vmatpush3.bf16.msra.mxu0 %v2934_v21  ;;  %v1465_v21 = vld [vmem:[#allocation10 + $0x1e0] sm:$0xff] }
  0xcb   :  { %2708 = vmatprep.subr.bf16.mxu0 %v2935_v22  ;;  %1365 = vmatpush1.bf16.msra.mxu1 %v2951_v37  ;;  %v3193_v22 = vld [vmem:[#allocation10 + $0x1c8] sm:$0xff]  ;;  %v1441_v37 = vld [vmem:[#allocation10 + $0x120] sm:$0xff] }
  0xcc   :  { %1366 = vmatprep.subr.bf16.mxu1 %v2956_v38  ;;  %v2607_v38 = vcombine.high %v1437_v36, %v1441_v37 }
  0xce   :  { %2709 = vmatpush3.bf16.msra.mxu0 %v2936_v23  ;;  %v2630_v23 = vcombine.low %v1461_v20, %v1465_v21 }
  0xcf   :  { %2710 = vmatprep.subr.bf16.mxu0 %v2937_v24  ;;  %1367 = vmatpush1.bf16.msra.mxu1 %v2954_v39  ;;  %v2631_v24 = vcombine.high %v1461_v20, %v1465_v21  ;;  %v2606_v39 = vcombine.low %v1437_v36, %v1441_v37  ;;  %v2540_v20 = vld [vmem:[%s3239_s4] ss:$0 sm:$0xff]  ;;  %v1446_v36 = vld [vmem:[#allocation10 + $0x148] sm:$0xff] }
  0xd0   :  { %1368 = vmatprep.subr.bf16.mxu1 %v2959_v40  ;;  %v1429_v40 = vld [vmem:[#allocation10 + $0xc0] sm:$0xff]  ;;  %v1450_v37 = vld [vmem:[#allocation10 + $0x168] sm:$0xff] }
  0xd2   :  { %2711 = vmatpush3.bf16.msra.mxu0 %v2938_v25  ;;  %v3195_v25 = vld [vmem:[#allocation10 + $0x1e8] sm:$0xff] }
  0xd3   :  { %2712 = vmatprep.subr.bf16.mxu0 %v2939_v26  ;;  %1369 = vmatpush1.bf16.msra.mxu1 %v2957_v41  ;;  %v1453_v26 = vld [vmem:[#allocation10 + $0x180] sm:$0xff] }
  0xd4   :  { %1370 = vmatprep.subr.bf16.mxu1 %v2962_v13  ;;  %v1433_v41 = vld [vmem:[#allocation10 + $0xe0] sm:$0xff] }
  0xd6   :  { %2713 = vmatpush3.bf16.msra.mxu0 %v2940_v27  ;;  %v1457_v27 = vld [vmem:[#allocation10 + $0x1a0] sm:$0xff] }
  0xd7   :  { %2714 = vmatprep.subr.bf16.mxu0 %v2941_v28  ;;  %1371 = vmatpush1.bf16.msra.mxu1 %v2960_v14  ;;  %v2632_v28 = vcombine.low %v3193_v22, %v3195_v25 }
  0xd8   :  { %1372 = vmatprep.subr.bf16.mxu1 %v2965_v15  ;;  %v1485_v15 = vld [vmem:[#allocation10 + $0x280] sm:$0xff] }
  0xda   :  { %2715 = vmatpush3.bf16.msra.mxu0 %v2942_v29  ;;  %v2633_v29 = vcombine.high %v3193_v22, %v3195_v25 }
  0xdb   :  { %2716 = vmatprep.subr.bf16.mxu0 %v2943_v30  ;;  %1373 = vmatpush1.bf16.msra.mxu1 %v2963_v16  ;;  %v2623_v30 = vcombine.high %v1453_v26, %v1457_v27  ;;  %v1489_v16 = vld [vmem:[#allocation10 + $0x2a0] sm:$0xff] }
  0xdc   :  { %1374 = vmatprep.subr.bf16.mxu1 %v2968_v17  ;;  %v2655_v17 = vcombine.high %v1485_v15, %v1489_v16 }
  0xde   :  { %2717 = vmatpush3.bf16.msra.mxu0 %v2944_v31  ;;  %v2622_v31 = vcombine.low %v1453_v26, %v1457_v27  ;;  %v2557_v27 = vld [vmem:[%s3240_s5] ss:$0 sm:$0xff] }
  0xdf   :  { %1375 = vmatpush1.bf16.msra.mxu1 %v2966_v18  ;;  %2215 = vmatprep.subr.bf16.mxu0 %v2631_v24  ;;  %v2654_v18 = vcombine.low %v1485_v15, %v1489_v16  ;;  %v1486_v16 = vld [vmem:[#allocation10 + $0x288] sm:$0xff] }
  0xe0   :  { %2256 = vmatprep.subr.bf16.mxu1 %v2633_v29 }
 0x141   :  { %v933_v42 = vpop.f32.mrf.mxu0 }
 0x142   :  { %v974_v43 = vpop.f32.mrf.mxu1  ;;  %v934_v57 = vadd.f32 %v933_v42, %v252_v55  ;;  %v2599_v42 = vcombine.high %v1429_v40, %v1433_v41  ;;  %v1405_v55 = vld [vmem:[#allocation10] sm:$0xff] }
 0x143   :  { %v935_v44 = vpop.f32.mrf.mxu0 }
 0x144   :  { %v976_v45 = vpop.f32.mrf.mxu1  ;;  %v936_v58 = vadd.f32 %v935_v44, %v256_v56  ;;  %v975_v59 = vadd.f32 %v974_v43, %v934_v57  ;;  %v2598_v43 = vcombine.low %v1429_v40, %v1433_v41  ;;  %v1421_v44 = vld [vmem:[#allocation10 + $0x80] sm:$0xff]  ;;  %v1438_v40 = vld [vmem:[#allocation10 + $0x108] sm:$0xff] }
 0x145   :  { %v937_v46 = vpop.f32.mrf.mxu0  ;;  %v1409_v56 = vld [vmem:[#allocation10 + $0x20] sm:$0xff]  ;;  %v1442_v41 = vld [vmem:[#allocation10 + $0x128] sm:$0xff] }
 0x146   :  { %v978_v47 = vpop.f32.mrf.mxu1  ;;  %v977_v62 = vadd.f32 %v976_v45, %v936_v58  ;;  %v1425_v45 = vld [vmem:[#allocation10 + $0xa0] sm:$0xff]  ;;  %v2575_v57 = vcombine.high %v1405_v55, %v1409_v56  ;;  %v2574_v58 = vcombine.low %v1405_v55, %v1409_v56  ;;  %v1406_v56 = vld [vmem:[#allocation10 + $0x8] sm:$0xff] }
 0x147   :  { %v938_v48 = vpop.f32.mrf.mxu0  ;;  %v2591_v46 = vcombine.high %v1421_v44, %v1425_v45  ;;  %v2590_v47 = vcombine.low %v1421_v44, %v1425_v45  ;;  %v1430_v44 = vld [vmem:[#allocation10 + $0xc8] sm:$0xff] }
 0x148   :  { %v979_v49 = vpop.f32.mrf.mxu1  ;;  %v1413_v48 = vld [vmem:[#allocation10 + $0x40] sm:$0xff]  ;;  %v1434_v45 = vld [vmem:[#allocation10 + $0xe8] sm:$0xff] }
 0x149   :  { %v1417_v49 = vld [vmem:[#allocation10 + $0x60] sm:$0xff]  ;;  %v2600_v22 = vcombine.low %v1430_v44, %v1434_v45 }
 0x14a   :  { %v2583_v50 = vcombine.high %v1413_v48, %v1417_v49  ;;  %v2582_v53 = vcombine.low %v1413_v48, %v1417_v49  ;;  %v1422_v48 = vld [vmem:[#allocation10 + $0x88] sm:$0xff] }
 0x14b   :  { %v1426_v49 = vld [vmem:[#allocation10 + $0xa8] sm:$0xff] }
 0x14c   :  { %v2593_v25 = vcombine.high %v1422_v48, %v1426_v49 }
 0x181   :  { %v1015_v60 = vpop.f32.mrf.mxu0 }
 0x182   :  { %v1056_v61 = vpop.f32.mrf.mxu1  ;;  %v1016_v63 = vadd.f32 %v1015_v60, %v975_v59  ;;  %v1525_v59 = vld [vmem:[#allocation10 + $0x3c0] sm:$0xff] }
 0x183   :  { %v1017_v0 = vpop.f32.mrf.mxu0  ;;  %v1529_v60 = vld [vmem:[#allocation10 + $0x3e0] sm:$0xff] }
 0x184   :  { %v1058_v1 = vpop.f32.mrf.mxu1  ;;  %v1057_v2 = vadd.f32 %v1056_v61, %v1016_v63  ;;  %v1018_v3 = vadd.f32 %v1017_v0, %v977_v62  ;;  %v2695_v61 = vcombine.high %v1525_v59, %v1529_v60  ;;  %v2694_v62 = vcombine.low %v1525_v59, %v1529_v60  ;;  %v1517_v63 = vld [vmem:[#allocation10 + $0x380] sm:$0xff]  ;;  %v1526_v60 = vld [vmem:[#allocation10 + $0x3c8] sm:$0xff] }
 0x185   :  { %v1019_v4 = vpop.f32.mrf.mxu0  ;;  %v1521_v0 = vld [vmem:[#allocation10 + $0x3a0] sm:$0xff] }
 0x186   :  { %v1060_v5 = vpop.f32.mrf.mxu1  ;;  %v1059_v6 = vadd.f32 %v1058_v1, %v1018_v3  ;;  %v1063_v7 = vmax.f32 %v1057_v2, 0.0  ;;  %v2687_v1 = vcombine.high %v1517_v63, %v1521_v0  ;;  %v2686_v2 = vcombine.low %v1517_v63, %v1521_v0  ;;  %v1509_v3 = vld [vmem:[#allocation10 + $0x340] sm:$0xff]  ;;  %v1518_v0 = vld [vmem:[#allocation10 + $0x388] sm:$0xff] }
 0x187   :  { %v1020_v8 = vpop.f32.mrf.mxu0  ;;  %v1513_v4 = vld [vmem:[#allocation10 + $0x360] sm:$0xff] }
 0x188   :  { %v1061_v9 = vpop.f32.mrf.mxu1  ;;  %v1064_v10 = vmax.f32 %v1059_v6, 0.0  ;;  %v1065_v12 = vpack.c.bf16 %v1063_v7, %v1063_v7  ;;  %v2679_v5 = vcombine.high %v1509_v3, %v1513_v4  ;;  %v2678_v6 = vcombine.low %v1509_v3, %v1513_v4  ;;  %v1501_v7 = vld [vmem:[#allocation10 + $0x300] sm:$0xff]  ;;  %v1510_v4 = vld [vmem:[#allocation10 + $0x348] sm:$0xff] }
 0x189   :  { %v1505_v8 = vld [vmem:[#allocation10 + $0x320] sm:$0xff] }
 0x18a   :  { %v1066_v11 = vpack.c.bf16 %v1064_v10, %v1064_v10  ;;  %v2671_v9 = vcombine.high %v1501_v7, %v1505_v8  ;;  %v2670_v10 = vcombine.low %v1501_v7, %v1505_v8  ;;  %v1502_v8 = vld [vmem:[#allocation10 + $0x308] sm:$0xff] }
 0x18c   :  { %1234 = vmatprep.mubr.bf16.mxu0 %v1066_v11  ;;  %v1493_v11 = vld [vmem:[#allocation10 + $0x2c0] sm:$0xff] }
 0x18d   :  { %1235 = vmatmul.mubr.bf16.vlgmr.msra.gmra.mxu0 %v1065_v12  ;;  %v1497_v12 = vld [vmem:[#allocation10 + $0x2e0] sm:$0xff] }
 0x18e   :  { %2216 = vmatpush1.bf16.msra.mxu0 %v2630_v23  ;;  %v2663_v13 = vcombine.high %v1493_v11, %v1497_v12  ;;  %v2662_v14 = vcombine.low %v1493_v11, %v1497_v12  ;;  %v1494_v12 = vld [vmem:[#allocation10 + $0x2c8] sm:$0xff] }
 0x18f   :  { %2217 = vmatprep.subr.bf16.mxu0 %v2623_v30 }
 0x192   :  { %2218 = vmatpush1.bf16.msra.mxu0 %v2622_v31  ;;  %v1454_v31 = vld [vmem:[#allocation10 + $0x188] sm:$0xff] }
 0x193   :  { %2219 = vmatprep.subr.bf16.mxu0 %v2615_v34 }
 0x196   :  { %2220 = vmatpush1.bf16.msra.mxu0 %v2614_v35  ;;  %v2625_v35 = vcombine.high %v1454_v31, %v1458_v32 }
 0x197   :  { %2221 = vmatprep.subr.bf16.mxu0 %v2607_v38  ;;  %v2624_v38 = vcombine.low %v1454_v31, %v1458_v32  ;;  %v1469_v32 = vld [vmem:[#allocation10 + $0x200] sm:$0xff] }
 0x19a   :  { %2222 = vmatpush1.bf16.msra.mxu0 %v2606_v39  ;;  %v2617_v39 = vcombine.high %v1446_v36, %v1450_v37 }
 0x19b   :  { %2223 = vmatprep.subr.bf16.mxu0 %v2599_v42  ;;  %v2616_v42 = vcombine.low %v1446_v36, %v1450_v37  ;;  %v1474_v36 = vld [vmem:[#allocation10 + $0x228] sm:$0xff] }
 0x19e   :  { %2224 = vmatpush1.bf16.msra.mxu0 %v2598_v43  ;;  %v2609_v43 = vcombine.high %v1438_v40, %v1442_v41 }
 0x19f   :  { %2225 = vmatprep.subr.bf16.mxu0 %v2591_v46  ;;  %v2608_v46 = vcombine.low %v1438_v40, %v1442_v41  ;;  %v1463_v40 = vld [vmem:[#allocation10 + $0x1d0] sm:$0xff] }
 0x1a0   :  { %v1467_v41 = vld [vmem:[#allocation10 + $0x1f0] sm:$0xff] }
 0x1a2   :  { %2226 = vmatpush1.bf16.msra.mxu0 %v2590_v47  ;;  %v2601_v47 = vcombine.high %v1430_v44, %v1434_v45  ;;  %v1468_v44 = vld [vmem:[#allocation10 + $0x1f8] sm:$0xff]  ;;  %v2634_v45 = vcombine.low %v1463_v40, %v1467_v41 }
 0x1a3   :  { %2227 = vmatprep.subr.bf16.mxu0 %v2583_v50  ;;  %v1418_v50 = vld [vmem:[#allocation10 + $0x68] sm:$0xff] }
 0x1a6   :  { %2228 = vmatpush1.bf16.msra.mxu0 %v2582_v53  ;;  %v2592_v53 = vcombine.low %v1422_v48, %v1426_v49  ;;  %v1268_v48 = vld [vmem:[%s3242_s7] sm:$0x3] }
 0x1a7   :  { %2229 = vmatprep.subr.bf16.mxu0 %v2575_v57  ;;  %v1410_v57 = vld [vmem:[#allocation10 + $0x28] sm:$0xff]  ;;  %v1273_v49 = vrot.slane %v1268_v48, %v3183_v52 }
 0x1a8   :  { %v2577_v59 = vcombine.high %v1406_v56, %v1410_v57 }
 0x1aa   :  { %2230 = vmatpush1.bf16.msra.mxu0 %v2574_v58 }
 0x1ab   :  { %2231 = vmatprep.subr.bf16.mxu0 %v2695_v61  ;;  %v1530_v61 = vld [vmem:[#allocation10 + $0x3e8] sm:$0xff] }
 0x1ac   :  { %v2697_v63 = vcombine.high %v1526_v60, %v1530_v61 }
 0x1ae   :  { %2232 = vmatpush2.bf16.msra.mxu0 %v2694_v62  ;;  %v2576_v62 = vcombine.low %v1406_v56, %v1410_v57 }
 0x1af   :  { %2233 = vmatprep.subr.bf16.mxu0 %v2687_v1  ;;  %v1522_v1 = vld [vmem:[#allocation10 + $0x3a8] sm:$0xff] }
 0x1b0   :  { %v2689_v3 = vcombine.high %v1518_v0, %v1522_v1 }
 0x1b2   :  { %2234 = vmatpush2.bf16.msra.mxu0 %v2686_v2  ;;  %v2696_v2 = vcombine.low %v1526_v60, %v1530_v61  ;;  %v1459_v60 = vld [vmem:[#allocation10 + $0x1b0] sm:$0xff]  ;;  %v1456_v61 = vld [vmem:[#allocation10 + $0x198] sm:$0xff] }
 0x1b3   :  { %2235 = vmatprep.subr.bf16.mxu0 %v2679_v5  ;;  %v1514_v5 = vld [vmem:[#allocation10 + $0x368] sm:$0xff] }
 0x1b4   :  { %v2681_v7 = vcombine.high %v1510_v4, %v1514_v5 }
 0x1b6   :  { %2236 = vmatpush2.bf16.msra.mxu0 %v2678_v6  ;;  %v2688_v6 = vcombine.low %v1518_v0, %v1522_v1  ;;  %v1447_v1 = vld [vmem:[#allocation10 + $0x150] sm:$0xff] }
 0x1b7   :  { %2237 = vmatprep.subr.bf16.mxu0 %v2671_v9  ;;  %v1506_v9 = vld [vmem:[#allocation10 + $0x328] sm:$0xff] }
 0x1b8   :  { %v2673_v11 = vcombine.high %v1502_v8, %v1506_v9 }
 0x1ba   :  { %2238 = vmatpush2.bf16.msra.mxu0 %v2670_v10  ;;  %v2680_v10 = vcombine.low %v1510_v4, %v1514_v5  ;;  %v1451_v4 = vld [vmem:[#allocation10 + $0x170] sm:$0xff]  ;;  %v1448_v5 = vld [vmem:[#allocation10 + $0x158] sm:$0xff] }
 0x1bb   :  { %2239 = vmatprep.subr.bf16.mxu0 %v2663_v13  ;;  %v1498_v13 = vld [vmem:[#allocation10 + $0x2e8] sm:$0xff] }
 0x1bc   :  { %v2665_v15 = vcombine.high %v1494_v12, %v1498_v13 }
 0x1be   :  { %2240 = vmatpush2.bf16.msra.mxu0 %v2662_v14  ;;  %v2672_v14 = vcombine.low %v1502_v8, %v1506_v9  ;;  %v2619_v9 = vcombine.high %v1447_v1, %v1451_v4 }
 0x1bf   :  { %2241 = vmatprep.subr.bf16.mxu0 %v2655_v17  ;;  %v1490_v17 = vld [vmem:[#allocation10 + $0x2a8] sm:$0xff] }
 0x1c2   :  { %2242 = vmatpush2.bf16.msra.mxu0 %v2654_v18  ;;  %v2664_v18 = vcombine.low %v1494_v12, %v1498_v13  ;;  %v1443_v12 = vld [vmem:[#allocation10 + $0x130] sm:$0xff]  ;;  %v1440_v13 = vld [vmem:[#allocation10 + $0x118] sm:$0xff] }
 0x24d   :  { %v2718_v19 = vpop.f32.mrf.mxu0 }
 0x24f   :  { %v2719_v21 = vpop.f32.mrf.mxu0 }
 0x250   :  { %v2720_v23 = vadd.f32 %v2719_v21, %v2718_v19  ;;  %v2657_v19 = vcombine.high %v1486_v16, %v1490_v17  ;;  %v1477_v21 = vld [vmem:[#allocation10 + $0x240] sm:$0xff] }
 0x251   :  { %v2721_v24 = vpop.f32.mrf.mxu0 }
 0x252   :  { %v1237_v26 = vadd.f32 %v2720_v23, %v2540_v20  ;;  %v2656_v20 = vcombine.low %v1486_v16, %v1490_v17  ;;  %v1481_v23 = vld [vmem:[#allocation10 + $0x260] sm:$0xff]  ;;  %v1478_v24 = vld [vmem:[#allocation10 + $0x248] sm:$0xff] }
 0x253   :  { %v2722_v29 = vpop.f32.mrf.mxu0 }
 0x254   :  { %v1242_v30 = vmax.f32 %v1237_v26, 0.0  ;;  %v2647_v26 = vcombine.high %v1477_v21, %v1481_v23  ;;  %v2646_v29 = vcombine.low %v1477_v21, %v1481_v23  ;;  %v1432_v21 = vld [vmem:[#allocation10 + $0xd8] sm:$0xff] }
 0x255   :  { %v1436_v23 = vld [vmem:[#allocation10 + $0xf8] sm:$0xff] }
 0x256   :  { %v1250_v33 = vadd.f32 %v2557_v27, %v1242_v30  ;;  %v1482_v27 = vld [vmem:[#allocation10 + $0x268] sm:$0xff]  ;;  %2243 = vmatprep.subr.bf16.mxu0 %v2647_v26 }
 0x257   :  { %v2648_v30 = vcombine.low %v1478_v24, %v1482_v27  ;;  %v2649_v31 = vcombine.high %v1478_v24, %v1482_v27  ;;  %2244 = vmatpush2.bf16.msra.mxu0 %v2646_v29  ;;  %v2605_v29 = vcombine.high %v1432_v21, %v1436_v23 }
 0x258   :  { %v1251_v34 = vpack.c.bf16 %v1250_v33, %v1250_v33  ;;  %v1473_v33 = vld [vmem:[#allocation10 + $0x220] sm:$0xff] }
 0x259   :  { %v2638_v37 = vcombine.low %v1469_v32, %v1473_v33 }
 0x25a   :  { %1393 = vmatmul.mubr.bf16.vlgmr.msra.gmra.mxu1 %v1251_v34  ;;  %v1470_v34 = vld [vmem:[#allocation10 + $0x208] sm:$0xff] }
 0x25b   :  { %2257 = vmatpush1.bf16.msra.mxu1 %v2632_v28  ;;  %v1414_v28 = vld [vmem:[#allocation10 + $0x48] sm:$0xff] }
 0x25c   :  { %2258 = vmatprep.subr.bf16.mxu1 %v2625_v35  ;;  %v2585_v55 = vcombine.high %v1414_v28, %v1418_v50  ;;  %v2584_v58 = vcombine.low %v1414_v28, %v1418_v50  ;;  %v2639_v35 = vcombine.high %v1469_v32, %v1473_v33  ;;  %v1424_v32 = vld [vmem:[#allocation10 + $0x98] sm:$0xff] }
 0x25d   :  { %v1428_v33 = vld [vmem:[#allocation10 + $0xb8] sm:$0xff] }
 0x25e   :  { %2245 = vmatprep.subr.bf16.mxu0 %v2639_v35  ;;  %v2604_v35 = vcombine.low %v1432_v21, %v1436_v23 }
 0x25f   :  { %2259 = vmatpush1.bf16.msra.mxu1 %v2624_v38  ;;  %v2640_v38 = vcombine.low %v1470_v34, %v1474_v36  ;;  %2246 = vmatpush2.bf16.msra.mxu0 %v2638_v37  ;;  %v2597_v37 = vcombine.high %v1424_v32, %v1428_v33 }
 0x260   :  { %2260 = vmatprep.subr.bf16.mxu1 %v2617_v39  ;;  %v2641_v39 = vcombine.high %v1470_v34, %v1474_v36 }
 0x263   :  { %2261 = vmatpush1.bf16.msra.mxu1 %v2616_v42  ;;  %v1464_v42 = vld [vmem:[#allocation10 + $0x1d8] sm:$0xff] }
 0x264   :  { %2262 = vmatprep.subr.bf16.mxu1 %v2609_v43  ;;  %v2635_v43 = vcombine.high %v1463_v40, %v1467_v41  ;;  %v1416_v40 = vld [vmem:[#allocation10 + $0x58] sm:$0xff] }
 0x265   :  { %v1420_v41 = vld [vmem:[#allocation10 + $0x78] sm:$0xff] }
 0x266   :  { %2297 = vmatprep.subr.bf16.mxu0 %v2635_v43  ;;  %v2596_v43 = vcombine.low %v1424_v32, %v1428_v33 }
 0x267   :  { %2263 = vmatpush1.bf16.msra.mxu1 %v2608_v46  ;;  %v2636_v46 = vcombine.low %v1464_v42, %v1468_v44 }
 0x268   :  { %2264 = vmatprep.subr.bf16.mxu1 %v2601_v47  ;;  %v2637_v47 = vcombine.high %v1464_v42, %v1468_v44 }
 0x26b   :  { %2265 = vmatpush1.bf16.msra.mxu1 %v2600_v22  ;;  %v1277_v22 = vrot.slane %v1268_v48, %v3189_v54  ;;  %v1408_v48 = vld [vmem:[#allocation10 + $0x18] sm:$0xff] }
 0x26c   :  { %2266 = vmatprep.subr.bf16.mxu1 %v2593_v25 }
 0x26f   :  { %2267 = vmatpush1.bf16.msra.mxu1 %v2592_v53 }
 0x270   :  { %2268 = vmatprep.subr.bf16.mxu1 %v2585_v55 }
 0x273   :  { %2269 = vmatpush1.bf16.msra.mxu1 %v2584_v58  ;;  %v1455_v58 = vld [vmem:[#allocation10 + $0x190] sm:$0xff] }
 0x274   :  { %2270 = vmatprep.subr.bf16.mxu1 %v2577_v59 }
 0x277   :  { %2271 = vmatpush1.bf16.msra.mxu1 %v2576_v62  ;;  %v1460_v62 = vld [vmem:[#allocation10 + $0x1b8] sm:$0xff] }
 0x278   :  { %2272 = vmatprep.subr.bf16.mxu1 %v2697_v63  ;;  %v2628_v8 = vcombine.low %v1456_v61, %v1460_v62 }
 0x27b   :  { %2273 = vmatpush2.bf16.msra.mxu1 %v2696_v2  ;;  %v2627_v2 = vcombine.high %v1455_v58, %v1459_v60 }
 0x27c   :  { %2274 = vmatprep.subr.bf16.mxu1 %v2689_v3  ;;  %v2629_v3 = vcombine.high %v1456_v61, %v1460_v62  ;;  %v1519_v62 = vld [vmem:[#allocation10 + $0x390] sm:$0xff] }
 0x27f   :  { %2275 = vmatpush2.bf16.msra.mxu1 %v2688_v6  ;;  %v1452_v6 = vld [vmem:[#allocation10 + $0x178] sm:$0xff] }
 0x280   :  { %2276 = vmatprep.subr.bf16.mxu1 %v2681_v7  ;;  %v2626_v7 = vcombine.low %v1455_v58, %v1459_v60  ;;  %v2620_v16 = vcombine.low %v1448_v5, %v1452_v6 }
 0x283   :  { %2277 = vmatpush2.bf16.msra.mxu1 %v2680_v10  ;;  %v2621_v10 = vcombine.high %v1448_v5, %v1452_v6 }
 0x284   :  { %2278 = vmatprep.subr.bf16.mxu1 %v2673_v11  ;;  %v1439_v11 = vld [vmem:[#allocation10 + $0x110] sm:$0xff] }
 0x285   :  { %v2611_v17 = vcombine.high %v1439_v11, %v1443_v12  ;;  %v2610_v24 = vcombine.low %v1439_v11, %v1443_v12 }
 0x287   :  { %2279 = vmatpush2.bf16.msra.mxu1 %v2672_v14  ;;  %v1444_v14 = vld [vmem:[#allocation10 + $0x138] sm:$0xff] }
 0x288   :  { %2280 = vmatprep.subr.bf16.mxu1 %v2665_v15  ;;  %v2618_v15 = vcombine.low %v1447_v1, %v1451_v4  ;;  %v2612_v26 = vcombine.low %v1440_v13, %v1444_v14  ;;  %v1520_v1 = vld [vmem:[#allocation10 + $0x398] sm:$0xff] }
 0x28b   :  { %2281 = vmatpush2.bf16.msra.mxu1 %v2664_v18  ;;  %v2613_v18 = vcombine.high %v1440_v13, %v1444_v14 }
 0x28c   :  { %2282 = vmatprep.subr.bf16.mxu1 %v2657_v19  ;;  %v1431_v19 = vld [vmem:[#allocation10 + $0xd0] sm:$0xff] }
 0x28f   :  { %2283 = vmatpush2.bf16.msra.mxu1 %v2656_v20  ;;  %v1435_v20 = vld [vmem:[#allocation10 + $0xf0] sm:$0xff] }
 0x290   :  { %2284 = vmatprep.subr.bf16.mxu1 %v2649_v31  ;;  %v2603_v27 = vcombine.high %v1431_v19, %v1435_v20  ;;  %v1427_v31 = vld [vmem:[#allocation10 + $0xb0] sm:$0xff]  ;;  %v2602_v34 = vcombine.low %v1431_v19, %v1435_v20 }
 0x293   :  { %2285 = vmatpush2.bf16.msra.mxu1 %v2648_v30  ;;  %v1423_v30 = vld [vmem:[#allocation10 + $0x90] sm:$0xff] }
 0x294   :  { %2286 = vmatprep.subr.bf16.mxu1 %v2641_v39  ;;  %v2595_v36 = vcombine.high %v1423_v30, %v1427_v31  ;;  %v1419_v39 = vld [vmem:[#allocation10 + $0x70] sm:$0xff]  ;;  %v2594_v42 = vcombine.low %v1423_v30, %v1427_v31 }
 0x297   :  { %2287 = vmatpush2.bf16.msra.mxu1 %v2640_v38  ;;  %v1415_v38 = vld [vmem:[#allocation10 + $0x50] sm:$0xff] }
 0x298   :  { %2338 = vmatprep.subr.bf16.mxu1 %v2637_v47  ;;  %v2587_v44 = vcombine.high %v1415_v38, %v1419_v39  ;;  %v1411_v47 = vld [vmem:[#allocation10 + $0x30] sm:$0xff] }
 0x31a   :  { %v1394_v25 = vpop.f32.mrf.mxu1 }
 0x31b   :  { %v1395_v28 = vadd.f32 %v1394_v25, %v1273_v49  ;;  %v1412_v49 = vld [vmem:[#allocation10 + $0x38] sm:$0xff]  ;;  %v2588_v25 = vcombine.low %v1416_v40, %v1420_v41 }
 0x31c   :  { %v1396_v50 = vpop.f32.mrf.mxu1 }
 0x31d   :  { %v1397_v53 = vadd.f32 %v1396_v50, %v1277_v22  ;;  %v1401_v55 = vmax.f32 %v1395_v28, 0.0  ;;  %v2586_v22 = vcombine.low %v1415_v38, %v1419_v39  ;;  %v2581_v50 = vcombine.high %v1408_v48, %v1412_v49 }
 0x31e   :  { %v1398_v56 = vpop.f32.mrf.mxu1 }
 0x31f   :  { %v1402_v57 = vmax.f32 %v1397_v53, 0.0  ;;  %v3215_v0 = vpack.c.bf16 %v1401_v55, %v1401_v55  ;;  %v1527_v53 = vld [vmem:[#allocation10 + $0x3d0] sm:$0xff]  ;;  %v1528_v56 = vld [vmem:[#allocation10 + $0x3d8] sm:$0xff] }
 0x320   :  { %v1399_v59 = vpop.f32.mrf.mxu1  ;;  %v1531_v55 = vld [vmem:[#allocation10 + $0x3f0] sm:$0xff] }
 0x321   :  { %v1404_v63 = vpack.c.bf16 %v1402_v57, %v1402_v57  ;;  %v1532_v57 = vld [vmem:[#allocation10 + $0x3f8] sm:$0xff]  ;;  %v2580_v59 = vcombine.low %v1408_v48, %v1412_v49  ;;  %v2699_v60 = vcombine.high %v1527_v53, %v1531_v55 }
 0x322   :  { %v2701_v61 = vcombine.high %v1528_v56, %v1532_v57  ;;  %v2700_v4 = vcombine.low %v1528_v56, %v1532_v57 }
 0x323   :  { %2247 = vmatprep.mubr.bf16.mxu0 %v1404_v63  ;;  %2288 = vmatprep.mubr.bf16.mxu1 %v1404_v63 }
 0x324   :  { %2248 = vmatmul.mubr.bf16.vlgmr.msra.gmra.mxu0 %v3215_v0  ;;  %2289 = vmatmul.mubr.bf16.vlgmr.msra.gmra.mxu1 %v3215_v0 }
 0x325   :  { %2298 = vmatpush1.bf16.msra.mxu0 %v2634_v45  ;;  %2339 = vmatpush1.bf16.msra.mxu1 %v2636_v46  ;;  %v2589_v45 = vcombine.high %v1416_v40, %v1420_v41  ;;  %v1407_v46 = vld [vmem:[#allocation10 + $0x10] sm:$0xff] }
 0x326   :  { %2329 = vmatprep.mubr.bf16.mxu0 %v1404_v63  ;;  %2370 = vmatprep.mubr.bf16.mxu1 %v1404_v63  ;;  %v2579_v28 = vcombine.high %v1407_v46, %v1411_v47  ;;  %v2578_v58 = vcombine.low %v1407_v46, %v1411_v47  ;;  %v1523_v63 = vld [vmem:[#allocation10 + $0x3b0] sm:$0xff] }
 0x327   :  { %2299 = vmatprep.subr.bf16.mxu0 %v2627_v2  ;;  %2340 = vmatprep.subr.bf16.mxu1 %v2629_v3  ;;  %v1524_v2 = vld [vmem:[#allocation10 + $0x3b8] sm:$0xff]  ;;  %v2698_v3 = vcombine.low %v1527_v53, %v1531_v55  ;;  %v2691_v5 = vcombine.high %v1519_v62, %v1523_v63  ;;  %v2690_v11 = vcombine.low %v1519_v62, %v1523_v63  ;;  %v1549_v62 = vsub.s32 3, %v3180_v51 }
 0x328   :  { %v2693_v6 = vcombine.high %v1520_v1, %v1524_v2  ;;  %v2692_v12 = vcombine.low %v1520_v1, %v1524_v2 }
 0x329   :  { %2300 = vmatpush1.bf16.msra.mxu0 %v2626_v7  ;;  %2341 = vmatpush1.bf16.msra.mxu1 %v2628_v8  ;;  %v1511_v7 = vld [vmem:[#allocation10 + $0x350] sm:$0xff] }
 0x32a   :  { %2301 = vmatprep.subr.bf16.mxu0 %v2619_v9  ;;  %2342 = vmatprep.subr.bf16.mxu1 %v2621_v10  ;;  %v1515_v8 = vld [vmem:[#allocation10 + $0x370] sm:$0xff]  ;;  %v1512_v9 = vld [vmem:[#allocation10 + $0x358] sm:$0xff] }
 0x32b   :  { %v1516_v10 = vld [vmem:[#allocation10 + $0x378] sm:$0xff]  ;;  %v2683_v13 = vcombine.high %v1511_v7, %v1515_v8  ;;  %v2682_v19 = vcombine.low %v1511_v7, %v1515_v8 }
 0x32c   :  { %v2685_v14 = vcombine.high %v1512_v9, %v1516_v10  ;;  %v2684_v20 = vcombine.low %v1512_v9, %v1516_v10 }
 0x32d   :  { %2302 = vmatpush1.bf16.msra.mxu0 %v2618_v15  ;;  %2343 = vmatpush1.bf16.msra.mxu1 %v2620_v16  ;;  %v1503_v15 = vld [vmem:[#allocation10 + $0x310] sm:$0xff] }
 0x32e   :  { %2303 = vmatprep.subr.bf16.mxu0 %v2611_v17  ;;  %2344 = vmatprep.subr.bf16.mxu1 %v2613_v18  ;;  %v1507_v16 = vld [vmem:[#allocation10 + $0x330] sm:$0xff]  ;;  %v1504_v17 = vld [vmem:[#allocation10 + $0x318] sm:$0xff] }
 0x32f   :  { %v1508_v18 = vld [vmem:[#allocation10 + $0x338] sm:$0xff]  ;;  %v2675_v21 = vcombine.high %v1503_v15, %v1507_v16  ;;  %v2674_v30 = vcombine.low %v1503_v15, %v1507_v16 }
 0x330   :  { %v2677_v23 = vcombine.high %v1504_v17, %v1508_v18  ;;  %v2676_v31 = vcombine.low %v1504_v17, %v1508_v18  ;;  %v1561_v18 = vsub.s32 6, %v3180_v51 }
 0x331   :  { %2304 = vmatpush1.bf16.msra.mxu0 %v2610_v24  ;;  %2345 = vmatpush1.bf16.msra.mxu1 %v2612_v26  ;;  %v1495_v24 = vld [vmem:[#allocation10 + $0x2d0] sm:$0xff] }
 0x332   :  { %2305 = vmatprep.subr.bf16.mxu0 %v2603_v27  ;;  %2346 = vmatprep.subr.bf16.mxu1 %v2605_v29  ;;  %v1499_v26 = vld [vmem:[#allocation10 + $0x2f0] sm:$0xff]  ;;  %v1496_v27 = vld [vmem:[#allocation10 + $0x2d8] sm:$0xff] }
 0x333   :  { %v1500_v29 = vld [vmem:[#allocation10 + $0x2f8] sm:$0xff]  ;;  %v2667_v32 = vcombine.high %v1495_v24, %v1499_v26  ;;  %v2666_v38 = vcombine.low %v1495_v24, %v1499_v26 }
 0x334   :  { %v2669_v33 = vcombine.high %v1496_v27, %v1500_v29  ;;  %v2668_v39 = vcombine.low %v1496_v27, %v1500_v29 }
 0x335   :  { %2306 = vmatpush1.bf16.msra.mxu0 %v2602_v34  ;;  %2347 = vmatpush1.bf16.msra.mxu1 %v2604_v35  ;;  %v1487_v34 = vld [vmem:[#allocation10 + $0x290] sm:$0xff] }
 0x336   :  { %2307 = vmatprep.subr.bf16.mxu0 %v2595_v36  ;;  %2348 = vmatprep.subr.bf16.mxu1 %v2597_v37  ;;  %v1491_v35 = vld [vmem:[#allocation10 + $0x2b0] sm:$0xff]  ;;  %v1488_v36 = vld [vmem:[#allocation10 + $0x298] sm:$0xff] }
 0x337   :  { %v1492_v37 = vld [vmem:[#allocation10 + $0x2b8] sm:$0xff]  ;;  %v2659_v40 = vcombine.high %v1487_v34, %v1491_v35  ;;  %v2658_v46 = vcombine.low %v1487_v34, %v1491_v35 }
 0x338   :  { %v2661_v41 = vcombine.high %v1488_v36, %v1492_v37  ;;  %v2660_v47 = vcombine.low %v1488_v36, %v1492_v37 }
 0x339   :  { %2308 = vmatpush1.bf16.msra.mxu0 %v2594_v42  ;;  %2349 = vmatpush1.bf16.msra.mxu1 %v2596_v43  ;;  %v1479_v42 = vld [vmem:[#allocation10 + $0x250] sm:$0xff] }
 0x33a   :  { %2309 = vmatprep.subr.bf16.mxu0 %v2587_v44  ;;  %2350 = vmatprep.subr.bf16.mxu1 %v2589_v45  ;;  %v1483_v43 = vld [vmem:[#allocation10 + $0x270] sm:$0xff]  ;;  %v1480_v44 = vld [vmem:[#allocation10 + $0x258] sm:$0xff] }
 0x33b   :  { %v1484_v45 = vld [vmem:[#allocation10 + $0x278] sm:$0xff]  ;;  %v2651_v48 = vcombine.high %v1479_v42, %v1483_v43  ;;  %v2650_v53 = vcombine.low %v1479_v42, %v1483_v43 }
 0x33c   :  { %v2653_v49 = vcombine.high %v1480_v44, %v1484_v45  ;;  %v2652_v55 = vcombine.low %v1480_v44, %v1484_v45 }
 0x33d   :  { %2310 = vmatpush1.bf16.msra.mxu0 %v2586_v22  ;;  %2351 = vmatpush1.bf16.msra.mxu1 %v2588_v25  ;;  %v1471_v22 = vld [vmem:[#allocation10 + $0x210] sm:$0xff] }
 0x33e   :  { %2311 = vmatprep.subr.bf16.mxu0 %v2579_v28  ;;  %2352 = vmatprep.subr.bf16.mxu1 %v2581_v50  ;;  %v1475_v25 = vld [vmem:[#allocation10 + $0x230] sm:$0xff]  ;;  %v1472_v28 = vld [vmem:[#allocation10 + $0x218] sm:$0xff] }
 0x33f   :  { %v1476_v50 = vld [vmem:[#allocation10 + $0x238] sm:$0xff]  ;;  %v2643_v56 = vcombine.high %v1471_v22, %v1475_v25 }
 0x340   :  { %v2645_v57 = vcombine.high %v1472_v28, %v1476_v50 }
 0x341   :  { %2312 = vmatpush1.bf16.msra.mxu0 %v2578_v58  ;;  %2353 = vmatpush1.bf16.msra.mxu1 %v2580_v59  ;;  %v2642_v58 = vcombine.low %v1471_v22, %v1475_v25  ;;  %v2644_v59 = vcombine.low %v1472_v28, %v1476_v50 }
 0x342   :  { %2313 = vmatprep.subr.bf16.mxu0 %v2699_v60  ;;  %2354 = vmatprep.subr.bf16.mxu1 %v2701_v61  ;;  %v1545_v60 = vsub.s32 2, %v3180_v51  ;;  %v1533_v61 = vld [vmem:[%s3244_s9] sm:$0xff]  ;;  %s3109_s9 = smov [#allocation11]  }
 0x343   :  { %v1538_v63 = vrot.slane %v1533_v61, %v3183_v52  ;;  %v1542_v2 = vrot.slane %v1533_v61, %v3189_v54  ;;  %v1553_v54 = vsub.s32 4, %v3180_v51  ;;  %s2401_s25 = sshll.u32 %s3109_s9, 4  ;;  %s2402_s25 = int_to_ptr.vmem [resolvable:$true] %s2401_s25 }
 0x344   :  { %v1546_v1 = vrot.slane %v1533_v61, %v1545_v60  ;;  %s3069_s26 = scalar_lea.vmem %s2402_s25, 1024  ;;  %p3074_p12 = scmp.lt.s32.totalorder %s2402_s25, %s2402_s25 }
 0x345   :  { %2314 = vmatpush2.bf16.msra.mxu0 %v2698_v3  ;;  %2355 = vmatpush2.bf16.msra.mxu1 %v2700_v4  ;;  %v1550_v3 = vrot.slane %v1533_v61, %v1549_v62  ;;  %p3070_p11 = scmp.ne.s32.totalorder %s2402_s25, %s3069_s26  ;;  %p3075_p13 = scmp.lt.s32.totalorder %s3069_s26, %s3069_s26 }
 0x346   :  { %2315 = vmatprep.subr.bf16.mxu0 %v2691_v5  ;;  %2356 = vmatprep.subr.bf16.mxu1 %v2693_v6 }
 0x347   :  { %p3076_p0 = por %p3075_p13, %p3074_p12 }
 0x349   :  { %2316 = vmatpush2.bf16.msra.mxu0 %v2690_v11  ;;  %2357 = vmatpush2.bf16.msra.mxu1 %v2692_v12  ;;  %p3077_p1 = pnand %p3076_p0, %p3070_p11 }
 0x34a   :  { %2317 = vmatprep.subr.bf16.mxu0 %v2683_v13  ;;  %2358 = vmatprep.subr.bf16.mxu1 %v2685_v14 }
 0x34d   :  { %2318 = vmatpush2.bf16.msra.mxu0 %v2682_v19  ;;  %2359 = vmatpush2.bf16.msra.mxu1 %v2684_v20  ;;  %v1557_v19 = vsub.s32 5, %v3180_v51  ;;  %v1565_v20 = vsub.s32 7, %v3180_v51 }
 0x34e   :  { %2319 = vmatprep.subr.bf16.mxu0 %v2675_v21  ;;  %2360 = vmatprep.subr.bf16.mxu1 %v2677_v23  ;;  %v1554_v21 = vrot.slane %v1533_v61, %v1553_v54  ;;  %v1562_v23 = vrot.slane %v1533_v61, %v1561_v18 }
 0x34f   :  { %v1558_v24 = vrot.slane %v1533_v61, %v1557_v19  ;;  %v1566_v26 = vrot.slane %v1533_v61, %v1565_v20 }
 0x351   :  { %2320 = vmatpush2.bf16.msra.mxu0 %v2674_v30  ;;  %2361 = vmatpush2.bf16.msra.mxu1 %v2676_v31 }
 0x352   :  { %2321 = vmatprep.subr.bf16.mxu0 %v2667_v32  ;;  %2362 = vmatprep.subr.bf16.mxu1 %v2669_v33 }
 0x355   :  { %2322 = vmatpush2.bf16.msra.mxu0 %v2666_v38  ;;  %2363 = vmatpush2.bf16.msra.mxu1 %v2668_v39 }
 0x356   :  { %2323 = vmatprep.subr.bf16.mxu0 %v2659_v40  ;;  %2364 = vmatprep.subr.bf16.mxu1 %v2661_v41 }
 0x359   :  { %2324 = vmatpush2.bf16.msra.mxu0 %v2658_v46  ;;  %2365 = vmatpush2.bf16.msra.mxu1 %v2660_v47 }
 0x35a   :  { %2325 = vmatprep.subr.bf16.mxu0 %v2651_v48  ;;  %2366 = vmatprep.subr.bf16.mxu1 %v2653_v49 }
 0x35d   :  { %2326 = vmatpush2.bf16.msra.mxu0 %v2650_v53  ;;  %2367 = vmatpush2.bf16.msra.mxu1 %v2652_v55 }
 0x35e   :  { %2327 = vmatprep.subr.bf16.mxu0 %v2643_v56  ;;  %2368 = vmatprep.subr.bf16.mxu1 %v2645_v57 }
 0x361   :  { %2328 = vmatpush2.bf16.msra.mxu0 %v2642_v58  ;;  %2369 = vmatpush2.bf16.msra.mxu1 %v2644_v59 }
 0x364   :  { %2330 = vmatmul.mubr.bf16.vlgmr.msra.gmra.mxu0 %v3215_v0  ;;  %2371 = vmatmul.mubr.bf16.vlgmr.msra.gmra.mxu1 %v3215_v0 }
 0x3e4   :  { %v2249_v4 = vpop.f32.mrf.mxu0  ;;  %v2290_v5 = vpop.f32.mrf.mxu1 }
 0x3e5   :  { %v2250_v6 = vadd.f32 %v2249_v4, %v1538_v63  ;;  %v2291_v7 = vadd.f32 %v2290_v5, %v1546_v1 }
 0x3e6   :  { %v2251_v8 = vpop.f32.mrf.mxu0  ;;  %v2292_v0 = vpop.f32.mrf.mxu1 }
 0x3e7   :  { %v2379_v9 = vmax.f32 %v2250_v6, 0.0  ;;  %v2381_v10 = vmax.f32 %v2291_v7, 0.0  ;;  %v2252_v11 = vadd.f32 %v2251_v8, %v1542_v2  ;;  %v2293_v12 = vadd.f32 %v2292_v0, %v1550_v3 }
 0x3e8   :  { %v2253_v13 = vpop.f32.mrf.mxu0  ;;  %v2294_v14 = vpop.f32.mrf.mxu1 }
 0x3e9   :  { %2387 = vst [vmem:[#allocation11] sm:$0xff] %v2379_v9  ;;  %2389 = vst [vmem:[#allocation11 + $0x10] sm:$0xff] %v2381_v10  ;;  %v2380_v15 = vmax.f32 %v2252_v11, 0.0  ;;  %v2382_v52 = vmax.f32 %v2293_v12, 0.0 }
 0x3ea   :  { %v2254_v16 = vpop.f32.mrf.mxu0  ;;  %v2295_v17 = vpop.f32.mrf.mxu1 }
 0x3eb   :  { %2388 = vst [vmem:[#allocation11 + $0x8] sm:$0xff] %v2380_v15  ;;  %2390 = vst [vmem:[#allocation11 + $0x18] sm:$0xff] %v2382_v52 }
 0x424   :  { %v2331_v27 = vpop.f32.mrf.mxu0  ;;  %v2372_v29 = vpop.f32.mrf.mxu1 }
 0x425   :  { %v2332_v30 = vadd.f32 %v2331_v27, %v1554_v21  ;;  %v2373_v31 = vadd.f32 %v2372_v29, %v1562_v23 }
 0x426   :  { %v2333_v32 = vpop.f32.mrf.mxu0  ;;  %v2374_v33 = vpop.f32.mrf.mxu1 }
 0x427   :  { %v2383_v34 = vmax.f32 %v2332_v30, 0.0  ;;  %v2385_v35 = vmax.f32 %v2373_v31, 0.0  ;;  %v2334_v36 = vadd.f32 %v2333_v32, %v1558_v24  ;;  %v2375_v37 = vadd.f32 %v2374_v33, %v1566_v26 }
 0x428   :  { %v2335_v38 = vpop.f32.mrf.mxu0  ;;  %v2376_v39 = vpop.f32.mrf.mxu1 }
 0x429   :  { %2391 = vst [vmem:[#allocation11 + $0x20] sm:$0xff] %v2383_v34  ;;  %2393 = vst [vmem:[#allocation11 + $0x30] sm:$0xff] %v2385_v35  ;;  %v2384_v51 = vmax.f32 %v2334_v36, 0.0  ;;  %v2386_v40 = vmax.f32 %v2375_v37, 0.0 }
 0x42a   :  { %v2336_v41 = vpop.f32.mrf.mxu0  ;;  %v2377_v42 = vpop.f32.mrf.mxu1 }
 0x42b   :  { %2392 = vst [vmem:[#allocation11 + $0x28] sm:$0xff] %v2384_v51  ;;  %2394 = vst [vmem:[#allocation11 + $0x38] sm:$0xff] %v2386_v40 }
 0x42c   :  { %3080 = shalt.err (!%p3077_p1)
}
 0x42d   :  { %2404 = dma.vmem_to_hbm [thread:$0]  %s2402_s25, 1024, %s3245_s10, [#allocation4]  }
 0x42e   :  { %3095 = dma.done.wait [#allocation4], 1024  }
 0x42f   :  { %3096 = vsyncadd [#allocation4], 4294966272 }
 0x430   :  { %2408 = vsyncpa [#allocation3], 1 }
 0x431   :  { %2409 = vsyncpa [#allocation6], 1 }
 0x432   :  { %2410 = vsyncpa [#allocation9], 1 }
 0x433   :  { %2411 = vsyncpa [#allocation4], 1 }

</bundles_post_ra>
